<compile_context>
chip_gen: v7x
topology: tpu7x:2x2x1
jax: 0.10.0
libtpu: 0.0.40
codegen_flags: <defaults>
</compile_context>

<pallas_src>
import functools

import jax
import jax.numpy as jnp
from jax import lax
from jax.experimental import pallas as pl
from jax.experimental.pallas import tpu as pltpu

_BN_EPS = 1e-5
_LANE = 128


def _round_up(v, m):
    return (v + m - 1) // m * m


def _pad2(a, rows, cols):
    out = jnp.zeros((rows, cols), jnp.float32)
    return out.at[: a.shape[0], : a.shape[1]].set(a.astype(jnp.float32))


# ----------------- fused GIN layer + virtual-node pooling (one kernel) -----------------

def _gin_vn_layer_kernel(batch_col_ref, batch_row_ref, src_ref, dst_ref, ea_ref,
                         h_ref, vn_ref, we_ref, be_ref, eps_ref,
                         w1_ref, b1_ref, w2_ref, b2_ref,
                         hnew_ref, pooled_ref,
                         hcur_s, aggr_s,
                         *, relu_out, compute_pooled):
    pid = pl.program_id(0)
    n_pad = hcur_s.shape[0]
    g_pad = vn_ref.shape[0]
    tile = src_ref.shape[0]

    # -- first edge-tile: h_cur = h + vn[batch] (one-hot matmul), zero accumulator,
    #    pooled = global_add_pool(h_cur) + vn (one-hot^T matmul). --
    @pl.when(pid == 0)
    def _init():
        batch_col = batch_col_ref[...]                                    # (N, 1)
        iota_ng = lax.broadcasted_iota(jnp.int32, (n_pad, g_pad), 1)
        oh_ng = (batch_col == iota_ng).astype(jnp.float32)                # (N, G)
        h_cur = h_ref[...] + jnp.dot(oh_ng, vn_ref[...],
                                     preferred_element_type=jnp.float32)
        hcur_s[...] = h_cur
        aggr_s[...] = jnp.zeros_like(aggr_s)
        if compute_pooled:
            batch_row = batch_row_ref[...]                                # (1, N)
            iota_gn = lax.broadcasted_iota(jnp.int32, (g_pad, n_pad), 0)
            oh_gn = (iota_gn == batch_row).astype(jnp.float32)            # (G, N)
            pooled_ref[...] = (jnp.dot(oh_gn, h_cur,
                                       preferred_element_type=jnp.float32)
                               + vn_ref[...])
        else:
            pooled_ref[...] = jnp.zeros_like(pooled_ref)

    # -- every edge-tile: vectorized gather / message / scatter via one-hot matmuls.
    #    Padded edges carry out-of-range indices -> all-zero one-hot rows/cols. --
    src = src_ref[...]                                                    # (T, 1)
    dst = dst_ref[...]                                                    # (1, T)
    iota_tn = lax.broadcasted_iota(jnp.int32, (tile, n_pad), 1)
    oh_src = (src == iota_tn).astype(jnp.float32)                         # (T, N)
    h_gather = jnp.dot(oh_src, hcur_s[...], preferred_element_type=jnp.float32)
    eemb = jnp.dot(ea_ref[...], we_ref[...],
                   preferred_element_type=jnp.float32) + be_ref[...]      # fused encoder
    msg = jnp.maximum(h_gather + eemb, 0.0)                               # (T, Dp)
    iota_nt = lax.broadcasted_iota(jnp.int32, (n_pad, tile), 0)
    oh_dst_t = (iota_nt == dst).astype(jnp.float32)                       # (N, T)
    aggr_s[...] += jnp.dot(oh_dst_t, msg, preferred_element_type=jnp.float32)

    # -- last edge-tile: GIN update + MLP (BatchNorms folded into the Linears). --
    @pl.when(pid == pl.num_programs(0) - 1)
    def _finish():
        eps = eps_ref[0, 0]
        z = (1.0 + eps) * hcur_s[...] + aggr_s[...]
        t_mid = jnp.dot(z, w1_ref[...], preferred_element_type=jnp.float32) + b1_ref[...]
        t_mid = jnp.where(t_mid > 0.0, t_mid, 0.1 * t_mid)                # LeakyReLU(0.1)
        h_out = jnp.dot(t_mid, w2_ref[...], preferred_element_type=jnp.float32) + b2_ref[...]
        if relu_out:                                                       # non-last layer
            h_out = jnp.maximum(h_out, 0.0)
        hnew_ref[...] = h_out


def gin_vn_layer(batch_col, batch_row, src_col, dst_row, edge_attr_p,
                 h, vn, we, be, eps, w1, b1, w2, b2,
                 *, relu_out, compute_pooled, edge_tile):
    n_pad, dp = h.shape
    g_pad = vn.shape[0]
    e_pad, kp = edge_attr_p.shape
    hp = w1.shape[1]
    n_tiles = e_pad // edge_tile

    kernel = functools.partial(_gin_vn_layer_kernel,
                               relu_out=relu_out, compute_pooled=compute_pooled)

    grid_spec = pltpu.PrefetchScalarGridSpec(
        num_scalar_prefetch=0,
        grid=(n_tiles,),
        in_specs=[
            pl.BlockSpec((n_pad, 1), lambda i: (0, 0)),                 # batch (column)
            pl.BlockSpec((1, n_pad), lambda i: (0, 0)),                 # batch (row)
            pl.BlockSpec((edge_tile, 1), lambda i: (i, 0)),             # src tile (column)
            pl.BlockSpec((1, edge_tile), lambda i: (0, i)),             # dst tile (row)
            pl.BlockSpec((edge_tile, kp), lambda i: (i, 0)),            # edge_attr tile
            pl.BlockSpec((n_pad, dp), lambda i: (0, 0)),                # h_prev (resident)
            pl.BlockSpec((g_pad, dp), lambda i: (0, 0)),                # vn     (resident)
            pl.BlockSpec((kp, dp), lambda i: (0, 0)),                   # We (edge encoder)
            pl.BlockSpec((1, dp), lambda i: (0, 0)),                    # be
            pl.BlockSpec(memory_space=pltpu.MemorySpace.SMEM),          # eps (scalar)
            pl.BlockSpec((dp, hp), lambda i: (0, 0)),                   # W1 (BN folded)
            pl.BlockSpec((1, hp), lambda i: (0, 0)),                    # b1
            pl.BlockSpec((hp, dp), lambda i: (0, 0)),                   # W2 (BN folded)
            pl.BlockSpec((1, dp), lambda i: (0, 0)),                    # b2
        ],
        out_specs=(
            pl.BlockSpec((n_pad, dp), lambda i: (0, 0)),                # h_new
            pl.BlockSpec((g_pad, dp), lambda i: (0, 0)),                # pooled + vn
        ),
        scratch_shapes=[
            pltpu.VMEM((n_pad, dp), jnp.float32),                       # h_cur
            pltpu.VMEM((n_pad, dp), jnp.float32),                       # aggregation acc
        ],
    )
    return pl.pallas_call(
        kernel,
        grid_spec=grid_spec,
        out_shape=(jax.ShapeDtypeStruct((n_pad, dp), jnp.float32),
                   jax.ShapeDtypeStruct((g_pad, dp), jnp.float32)),
        compiler_params=pltpu.CompilerParams(
            dimension_semantics=("arbitrary",),
            vmem_limit_bytes=64 * 1024 * 1024),
    )(batch_col, batch_row, src_col, dst_row, edge_attr_p,
      h, vn, we, be, eps, w1, b1, w2, b2)


# ---------------------- virtual-node MLP (2 Linears + folded BN + ReLU) ----------------------

def _vn_mlp_kernel(p_ref, w1_ref, b1_ref, w2_ref, b2_ref, o_ref):
    t = jnp.dot(p_ref[...], w1_ref[...], preferred_element_type=jnp.float32) + b1_ref[...]
    t = jnp.maximum(t, 0.0)
    v = jnp.dot(t, w2_ref[...], preferred_element_type=jnp.float32) + b2_ref[...]
    o_ref[...] = jnp.maximum(v, 0.0)


def vn_mlp(pooled, w1, b1, w2, b2):
    g, dp = pooled.shape
    vmem = pl.BlockSpec(memory_space=pltpu.MemorySpace.VMEM)
    return pl.pallas_call(
        _vn_mlp_kernel,
        out_shape=jax.ShapeDtypeStruct((g, dp), jnp.float32),
        in_specs=[vmem] * 5,
        out_specs=vmem,
    )(pooled, w1, b1, w2, b2)


# ------------------------------ parameter creation / prep ------------------------------

def _fresh_bn(dim):
    gamma = jnp.ones((1, dim), jnp.float32)
    beta = jnp.zeros((1, dim), jnp.float32)
    mean = jnp.zeros((1, dim), jnp.float32)
    var = jnp.ones((1, dim), jnp.float32)
    scale = gamma / jnp.sqrt(var + _BN_EPS)
    shift = beta - mean * scale
    return scale, shift


def _linear_init(key, din, dout):
    kw, kb = jax.random.split(key)
    bound = 1.0 / (din ** 0.5)
    w = jax.random.uniform(kw, (din, dout), jnp.float32, -bound, bound)
    b = jax.random.uniform(kb, (1, dout), jnp.float32, -bound, bound)
    return w, b


def init_params(key, num_layer, emb_dim):
    D = emb_dim
    keys = jax.random.split(key, 1 + 3 * num_layer + 2 * (num_layer - 1))
    ki = iter(keys)
    params = {
        "node_emb": jax.random.normal(next(ki), (1, D), jnp.float32),  # node_encoder
        "vn_emb": jnp.zeros((1, D), jnp.float32),                      # init.constant_(0)
        "layers": [],
        "vn_mlps": [],
    }
    for _ in range(num_layer):
        We, be = _linear_init(next(ki), 7, D)        # GINConv.edge_encoder
        W1, b1 = _linear_init(next(ki), D, 2 * D)    # GIN mlp Linear 1
        W2, b2 = _linear_init(next(ki), 2 * D, D)    # GIN mlp Linear 2
        bn1_s, bn1_b = _fresh_bn(2 * D)              # BN inside GIN mlp
        bno_s, bno_b = _fresh_bn(D)                  # outer batch_norms[layer]
        params["layers"].append(dict(
            We=We, be=be, eps=jnp.zeros((1,), jnp.float32),
            W1=W1, b1=b1, bn1_scale=bn1_s, bn1_shift=bn1_b,
            W2=W2, b2=b2, bn_out_scale=bno_s, bn_out_shift=bno_b))
    for _ in range(num_layer - 1):
        Wv1, bv1 = _linear_init(next(ki), D, 2 * D)
        Wv2, bv2 = _linear_init(next(ki), 2 * D, D)
        bnv1_s, bnv1_b = _fresh_bn(2 * D)
        bnv2_s, bnv2_b = _fresh_bn(D)
        params["vn_mlps"].append(dict(
            W1=Wv1, b1=bv1, bn1_scale=bnv1_s, bn1_shift=bnv1_b,
            W2=Wv2, b2=bv2, bn2_scale=bnv2_s, bn2_shift=bnv2_b))
    return params


def _fold_linear_bn(W, b, scale, shift):
    return W * scale, b * scale + shift


def prepare_params(params, emb_dim):
    """Fold eval-BatchNorm into the Linears; pad feature dims lane-dense (K only to 8)."""
    D = emb_dim
    Dp = _round_up(D, _LANE)
    Hp = _round_up(2 * D, _LANE)
    Kp = 8                                            # edge_attr features (7 -> 8)
    prep = {"Dp": Dp, "Hp": Hp, "Kp": Kp,
            "node_emb": _pad2(params["node_emb"], params["node_emb"].shape[0], Dp),
            "layers": [], "vn_mlps": []}
    for p in params["layers"]:
        W1f, b1f = _fold_linear_bn(p["W1"], p["b1"], p["bn1_scale"], p["bn1_shift"])
        W2f, b2f = _fold_linear_bn(p["W2"], p["b2"], p["bn_out_scale"], p["bn_out_shift"])
        prep["layers"].append(dict(
            We=_pad2(p["We"], Kp, Dp), be=_pad2(p["be"], 1, Dp),
            eps=p["eps"].reshape(1, 1).astype(jnp.float32),
            W1=_pad2(W1f, Dp, Hp), b1=_pad2(b1f, 1, Hp),
            W2=_pad2(W2f, Hp, Dp), b2=_pad2(b2f, 1, Dp)))
    for p in params["vn_mlps"]:
        W1f, b1f = _fold_linear_bn(p["W1"], p["b1"], p["bn1_scale"], p["bn1_shift"])
        W2f, b2f = _fold_linear_bn(p["W2"], p["b2"], p["bn2_scale"], p["bn2_shift"])
        prep["vn_mlps"].append(dict(
            W1=_pad2(W1f, Dp, Hp), b1=_pad2(b1f, 1, Hp),
            W2=_pad2(W2f, Hp, Dp), b2=_pad2(b2f, 1, Dp)))
    return prep


# --------------------------------------- forward ---------------------------------------

def gnn_node_virtualnode_forward(prep, x, edge_index, edge_attr, batch,
                                 num_layer, emb_dim, num_graphs, edge_tile=512):
    assert edge_tile % _LANE == 0, "edge_tile must be a multiple of 128"
    N = x.shape[0]
    E = edge_index.shape[1]
    G = num_graphs                                    # static: no device readback
    Dp, Kp = prep["Dp"], prep["Kp"]

    N_pad = _round_up(N, 8)
    G_pad = _round_up(G, 8)
    E_pad = _round_up(E, edge_tile)

    # Padded nodes/edges get out-of-range indices -> zero one-hot rows (no mask needed).
    batch_i = batch.astype(jnp.int32)
    batch_col = jnp.full((N_pad, 1), G_pad, jnp.int32).at[:N, 0].set(batch_i)
    batch_row = batch_col[:, 0].reshape(1, N_pad)
    src_col = jnp.full((E_pad, 1), N_pad, jnp.int32).at[:E, 0].set(
        edge_index[0].astype(jnp.int32))
    dst_row = jnp.full((1, E_pad), N_pad, jnp.int32).at[0, :E].set(
        edge_index[1].astype(jnp.int32))
    edge_attr_p = jnp.zeros((E_pad, Kp), jnp.float32).at[:E, :7].set(
        edge_attr.astype(jnp.float32))

    h0 = prep["node_emb"][x]                          # node_encoder(x)       [N, Dp]
    h = jnp.zeros((N_pad, Dp), jnp.float32).at[:N].set(h0)
    vn = jnp.zeros((G_pad, Dp), jnp.float32)          # virtualnode_embedding == 0

    for layer in range(num_layer):
        p = prep["layers"][layer]
        last = layer == num_layer - 1
        h, pooled = gin_vn_layer(batch_col, batch_row, src_col, dst_row, edge_attr_p,
                                 h, vn, p["We"], p["be"], p["eps"],
                                 p["W1"], p["b1"], p["W2"], p["b2"],
                                 relu_out=not last, compute_pooled=not last,
                                 edge_tile=edge_tile)
        if not last:
            pv = prep["vn_mlps"][layer]
            vn = vn_mlp(pooled, pv["W1"], pv["b1"], pv["W2"], pv["b2"])

    return h[:N, :emb_dim]                            # JK == 'last'; drop padding


# ----------------------------- pure-JAX reference (check) ------------------------------

def ref_forward(params, x, edge_index, edge_attr, batch, num_layer, emb_dim, num_graphs):
    N = x.shape[0]
    G = num_graphs
    row, col = edge_index[0], edge_index[1]
    vn = jnp.tile(params["vn_emb"], (G, 1))
    h_list = [params["node_emb"][x]]
    for layer in range(num_layer):
        p = params["layers"][layer]
        h_cur = h_list[layer] + vn[batch]
        h_list[layer] = h_cur
        edge_emb = edge_attr @ p["We"] + p["be"]
        msg = jnp.maximum(h_cur[row] + edge_emb, 0.0)
        aggr = jax.ops.segment_sum(msg, col, num_segments=N)
        z = (1.0 + p["eps"]) * h_cur + aggr
        t = (z @ p["W1"] + p["b1"]) * p["bn1_scale"] + p["bn1_shift"]
        t = jnp.where(t > 0.0, t, 0.1 * t)
        h = (t @ p["W2"] + p["b2"]) * p["bn_out_scale"] + p["bn_out_shift"]
        if layer < num_layer - 1:
            h = jnp.maximum(h, 0.0)
        h_list.append(h)
        if layer < num_layer - 1:
            pv = params["vn_mlps"][layer]
            pooled = jax.ops.segment_sum(h_cur, batch, num_segments=G) + vn
            t = jnp.maximum((pooled @ pv["W1"] + pv["b1"]) * pv["bn1_scale"]
                            + pv["bn1_shift"], 0.0)
            vn = jnp.maximum((t @ pv["W2"] + pv["b2"]) * pv["bn2_scale"]
                             + pv["bn2_shift"], 0.0)
    return h_list[-1]


# ------------------------------------------ main ------------------------------------------

if __name__ == "__main__":
    num_layer, emb_dim = 3, 32
    sizes = [7, 7, 6]                                 # nodes per graph
    G = len(sizes)
    N = sum(sizes)                                    # 20 -> N_pad 24 (exercises padding)
    E_per_graph = 100
    E = G * E_per_graph                               # 300 -> 3 edge tiles at edge_tile=128

    key = jax.random.PRNGKey(0)
    k_params, k_edges, k_ea = jax.random.split(key, 3)
    params = init_params(k_params, num_layer, emb_dim)
    prep = prepare_params(params, emb_dim)

    # node_encoder = Embedding(1, emb_dim) => node "features" are index 0 everywhere
    x = jnp.zeros((N,), jnp.int32)
    batch = jnp.concatenate(
        [jnp.full((s,), g, jnp.int32) for g, s in enumerate(sizes)])

    # random edges, kept within each graph
    starts = [0, sizes[0], sizes[0] + sizes[1]]
    ek = jax.random.split(k_edges, 2 * G)
    rows, cols = [], []
    for g in range(G):
        lo, hi = starts[g], starts[g] + sizes[g]
        rows.append(jax.random.randint(ek[2 * g], (E_per_graph,), lo, hi))
        cols.append(jax.random.randint(ek[2 * g + 1], (E_per_graph,), lo, hi))
    edge_index = jnp.stack([jnp.concatenate(rows), jnp.concatenate(cols)]).astype(jnp.int32)
    edge_attr = jax.random.normal(k_ea, (E, 7), jnp.float32)

    out = gnn_node_virtualnode_forward(prep, x, edge_index, edge_attr, batch,
                                       num_layer, emb_dim, num_graphs=G,
                                       edge_tile=128)
    out = jax.block_until_ready(out)
    assert out.shape == (N, emb_dim), out.shape

    ref = ref_forward(params, x, edge_index, edge_attr, batch, num_layer, emb_dim, G)
    if not bool(jnp.allclose(out, ref, atol=1e-3, rtol=1e-3)):
        raise AssertionError("Pallas kernel output does not match pure-JAX reference")

    print("KERNEL_OK")
</pallas_src>

<mosaic_0001>
module attributes {stable_mosaic.version = 11 : i64} {
  func.func @_gin_vn_layer_kernel(%arg0: i32, %arg1: memref<24x1xi32, #tpu.memory_space<vmem>>, %arg2: memref<1x24xi32, #tpu.memory_space<vmem>>, %arg3: memref<128x1xi32, #tpu.memory_space<vmem>>, %arg4: memref<1x128xi32, #tpu.memory_space<vmem>>, %arg5: memref<128x8xf32, #tpu.memory_space<vmem>>, %arg6: memref<24x128xf32, #tpu.memory_space<vmem>>, %arg7: memref<8x128xf32, #tpu.memory_space<vmem>>, %arg8: memref<8x128xf32, #tpu.memory_space<vmem>>, %arg9: memref<1x128xf32, #tpu.memory_space<vmem>>, %arg10: memref<1x1xf32, #tpu.memory_space<smem>>, %arg11: memref<128x128xf32, #tpu.memory_space<vmem>>, %arg12: memref<1x128xf32, #tpu.memory_space<vmem>>, %arg13: memref<128x128xf32, #tpu.memory_space<vmem>>, %arg14: memref<1x128xf32, #tpu.memory_space<vmem>>, %arg15: memref<24x128xf32, #tpu.memory_space<vmem>>, %arg16: memref<8x128xf32, #tpu.memory_space<vmem>>, %arg17: memref<24x128xf32, #tpu.memory_space<vmem>>, %arg18: memref<24x128xf32, #tpu.memory_space<vmem>>) attributes {dimension_semantics = [#tpu.dimension_semantics<arbitrary>], iteration_bounds = array<i64: 3>, scalar_prefetch = 0 : i64, scratch_operands = 2 : i64, tpu.core_type = #tpu.core_type<tc>, window_params = [{pipeline_mode = #tpu.pipeline_mode<synchronous>, transform_indices = @transform_0, window_bounds = array<i64: 24, 1>}, {pipeline_mode = #tpu.pipeline_mode<synchronous>, transform_indices = @transform_1, window_bounds = array<i64: 1, 24>}, {transform_indices = @transform_2, window_bounds = array<i64: 128, 1>}, {transform_indices = @transform_3, window_bounds = array<i64: 1, 128>}, {transform_indices = @transform_4, window_bounds = array<i64: 128, 8>}, {pipeline_mode = #tpu.pipeline_mode<synchronous>, transform_indices = @transform_5, window_bounds = array<i64: 24, 128>}, {pipeline_mode = #tpu.pipeline_mode<synchronous>, transform_indices = @transform_6, window_bounds = array<i64: 8, 128>}, {pipeline_mode = #tpu.pipeline_mode<synchronous>, transform_indices = @transform_7, window_bounds = array<i64: 8, 128>}, {pipeline_mode = #tpu.pipeline_mode<synchronous>, transform_indices = @transform_8, window_bounds = array<i64: 1, 128>}, {transform_indices = @transform_9, window_bounds = array<i64: 1, 1>}, {pipeline_mode = #tpu.pipeline_mode<synchronous>, transform_indices = @transform_10, window_bounds = array<i64: 128, 128>}, {pipeline_mode = #tpu.pipeline_mode<synchronous>, transform_indices = @transform_11, window_bounds = array<i64: 1, 128>}, {pipeline_mode = #tpu.pipeline_mode<synchronous>, transform_indices = @transform_12, window_bounds = array<i64: 128, 128>}, {pipeline_mode = #tpu.pipeline_mode<synchronous>, transform_indices = @transform_13, window_bounds = array<i64: 1, 128>}, {pipeline_mode = #tpu.pipeline_mode<synchronous>, transform_indices = @transform_14, window_bounds = array<i64: 24, 128>}, {pipeline_mode = #tpu.pipeline_mode<synchronous>, transform_indices = @transform_15, window_bounds = array<i64: 8, 128>}]} {
    %c0_i32 = arith.constant 0 : i32
    %0 = arith.cmpi eq, %arg0, %c0_i32 : i32
    %1 = arith.extui %0 : i1 to i32
    %c0_i32_0 = arith.constant 0 : i32
    %2 = arith.cmpi ne, %1, %c0_i32_0 : i32
    scf.if %2 {
      %c0_20 = arith.constant 0 : index
      %c0_21 = arith.constant 0 : index
      %33 = vector.load %arg1[%c0_20, %c0_21] : memref<24x1xi32, #tpu.memory_space<vmem>>, vector<24x1xi32>
      %34 = tpu.iota {dimensions = array<i32: 1>} : vector<24x8xi32>
      %35 = vector.broadcast %33 : vector<24x1xi32> to vector<24x8xi32>
      %36 = arith.cmpi eq, %35, %34 : vector<24x8xi32>
      %37 = arith.extui %36 : vector<24x8xi1> to vector<24x8xi32>
      %38 = arith.sitofp %37 : vector<24x8xi32> to vector<24x8xf32>
      %c0_22 = arith.constant 0 : index
      %c0_23 = arith.constant 0 : index
      %39 = vector.load %arg6[%c0_22, %c0_23] : memref<24x128xf32, #tpu.memory_space<vmem>>, vector<24x128xf32>
      %c0_24 = arith.constant 0 : index
      %c0_25 = arith.constant 0 : index
      %40 = vector.load %arg7[%c0_24, %c0_25] : memref<8x128xf32, #tpu.memory_space<vmem>>, vector<8x128xf32>
      %cst_26 = arith.constant dense<0.000000e+00> : vector<24x128xf32>
      %41 = tpu.matmul %38, %40, %cst_26 {dimension_numbers = #tpu.dot_dimension_numbers<[1], [0], [0], [1], [0, 0, 1, 1], [], []>} : vector<24x8xf32>, vector<8x128xf32>, vector<24x128xf32> -> vector<24x128xf32>
      %42 = arith.addf %39, %41 : vector<24x128xf32>
      %c0_27 = arith.constant 0 : index
      %c0_28 = arith.constant 0 : index
      %43 = vector.load %arg17[%c0_27, %c0_28] : memref<24x128xf32, #tpu.memory_space<vmem>>, vector<24x128xf32>
      tpu.vector_store %arg17[%c0_27, %c0_28], %42 {strides = array<i32>} : memref<24x128xf32, #tpu.memory_space<vmem>>, vector<24x128xf32>,
      %cst_29 = arith.constant 0.000000e+00 : f32
      %44 = vector.broadcast %cst_29 : f32 to vector<24x128xf32>
      %c0_30 = arith.constant 0 : index
      %c0_31 = arith.constant 0 : index
      %45 = vector.load %arg18[%c0_30, %c0_31] : memref<24x128xf32, #tpu.memory_space<vmem>>, vector<24x128xf32>
      tpu.vector_store %arg18[%c0_30, %c0_31], %44 {strides = array<i32>} : memref<24x128xf32, #tpu.memory_space<vmem>>, vector<24x128xf32>,
      %c0_32 = arith.constant 0 : index
      %c0_33 = arith.constant 0 : index
      %46 = vector.load %arg2[%c0_32, %c0_33] : memref<1x24xi32, #tpu.memory_space<vmem>>, vector<1x24xi32>
      %47 = tpu.iota {dimensions = array<i32: 0>} : vector<8x24xi32>
      %48 = vector.broadcast %46 : vector<1x24xi32> to vector<8x24xi32>
      %49 = arith.cmpi eq, %47, %48 : vector<8x24xi32>
      %50 = arith.extui %49 : vector<8x24xi1> to vector<8x24xi32>
      %51 = arith.sitofp %50 : vector<8x24xi32> to vector<8x24xf32>
      %cst_34 = arith.constant dense<0.000000e+00> : vector<8x128xf32>
      %52 = tpu.matmul %51, %42, %cst_34 {dimension_numbers = #tpu.dot_dimension_numbers<[1], [0], [0], [1], [0, 0, 1, 1], [], []>} : vector<8x24xf32>, vector<24x128xf32>, vector<8x128xf32> -> vector<8x128xf32>
      %c0_35 = arith.constant 0 : index
      %c0_36 = arith.constant 0 : index
      %53 = vector.load %arg7[%c0_35, %c0_36] : memref<8x128xf32, #tpu.memory_space<vmem>>, vector<8x128xf32>
      %54 = arith.addf %52, %53 : vector<8x128xf32>
      %c0_37 = arith.constant 0 : index
      %c0_38 = arith.constant 0 : index
      %55 = vector.load %arg16[%c0_37, %c0_38] : memref<8x128xf32, #tpu.memory_space<vmem>>, vector<8x128xf32>
      tpu.vector_store %arg16[%c0_37, %c0_38], %54 {strides = array<i32>} : memref<8x128xf32, #tpu.memory_space<vmem>>, vector<8x128xf32>,
    } else {
    }
    %c0 = arith.constant 0 : index
    %c0_1 = arith.constant 0 : index
    %3 = vector.load %arg3[%c0, %c0_1] : memref<128x1xi32, #tpu.memory_space<vmem>>, vector<128x1xi32>
    %c0_2 = arith.constant 0 : index
    %c0_3 = arith.constant 0 : index
    %4 = vector.load %arg4[%c0_2, %c0_3] : memref<1x128xi32, #tpu.memory_space<vmem>>, vector<1x128xi32>
    %5 = tpu.iota {dimensions = array<i32: 1>} : vector<128x24xi32>
    %6 = vector.broadcast %3 : vector<128x1xi32> to vector<128x24xi32>
    %7 = arith.cmpi eq, %6, %5 : vector<128x24xi32>
    %8 = arith.extui %7 : vector<128x24xi1> to vector<128x24xi32>
    %9 = arith.sitofp %8 : vector<128x24xi32> to vector<128x24xf32>
    %c0_4 = arith.constant 0 : index
    %c0_5 = arith.constant 0 : index
    %10 = vector.load %arg17[%c0_4, %c0_5] : memref<24x128xf32, #tpu.memory_space<vmem>>, vector<24x128xf32>
    %cst = arith.constant dense<0.000000e+00> : vector<128x128xf32>
    %11 = tpu.matmul %9, %10, %cst {dimension_numbers = #tpu.dot_dimension_numbers<[1], [0], [0], [1], [0, 0, 1, 1], [], []>} : vector<128x24xf32>, vector<24x128xf32>, vector<128x128xf32> -> vector<128x128xf32>
    %c0_6 = arith.constant 0 : index
    %c0_7 = arith.constant 0 : index
    %12 = vector.load %arg5[%c0_6, %c0_7] : memref<128x8xf32, #tpu.memory_space<vmem>>, vector<128x8xf32>
    %c0_8 = arith.constant 0 : index
    %c0_9 = arith.constant 0 : index
    %13 = vector.load %arg8[%c0_8, %c0_9] : memref<8x128xf32, #tpu.memory_space<vmem>>, vector<8x128xf32>
    %cst_10 = arith.constant dense<0.000000e+00> : vector<128x128xf32>
    %14 = tpu.matmul %12, %13, %cst_10 {dimension_numbers = #tpu.dot_dimension_numbers<[1], [0], [0], [1], [0, 0, 1, 1], [], []>} : vector<128x8xf32>, vector<8x128xf32>, vector<128x128xf32> -> vector<128x128xf32>
    %c0_11 = arith.constant 0 : index
    %c0_12 = arith.constant 0 : index
    %15 = vector.load %arg9[%c0_11, %c0_12] : memref<1x128xf32, #tpu.memory_space<vmem>>, vector<1x128xf32>
    %16 = vector.broadcast %15 : vector<1x128xf32> to vector<128x128xf32>
    %17 = arith.addf %14, %16 : vector<128x128xf32>
    %18 = arith.addf %11, %17 : vector<128x128xf32>
    %cst_13 = arith.constant 0.000000e+00 : f32
    %19 = vector.broadcast %cst_13 : f32 to vector<128x128xf32>
    %20 = arith.maximumf %18, %19 : vector<128x128xf32>
    %21 = tpu.iota {dimensions = array<i32: 0>} : vector<24x128xi32>
    %22 = vector.broadcast %4 : vector<1x128xi32> to vector<24x128xi32>
    %23 = arith.cmpi eq, %21, %22 : vector<24x128xi32>
    %24 = arith.extui %23 : vector<24x128xi1> to vector<24x128xi32>
    %25 = arith.sitofp %24 : vector<24x128xi32> to vector<24x128xf32>
    %c0_14 = arith.constant 0 : index
    %c0_15 = arith.constant 0 : index
    %26 = vector.load %arg18[%c0_14, %c0_15] : memref<24x128xf32, #tpu.memory_space<vmem>>, vector<24x128xf32>
    %cst_16 = arith.constant dense<0.000000e+00> : vector<24x128xf32>
    %27 = tpu.matmul %25, %20, %cst_16 {dimension_numbers = #tpu.dot_dimension_numbers<[1], [0], [0], [1], [0, 0, 1, 1], [], []>} : vector<24x128xf32>, vector<128x128xf32>, vector<24x128xf32> -> vector<24x128xf32>
    %28 = arith.addf %26, %27 : vector<24x128xf32>
    %c0_17 = arith.constant 0 : index
    %c0_18 = arith.constant 0 : index
    %29 = vector.load %arg18[%c0_17, %c0_18] : memref<24x128xf32, #tpu.memory_space<vmem>>, vector<24x128xf32>
    tpu.vector_store %arg18[%c0_17, %c0_18], %28 {strides = array<i32>} : memref<24x128xf32, #tpu.memory_space<vmem>>, vector<24x128xf32>,
    %c2_i32 = arith.constant 2 : i32
    %30 = arith.cmpi eq, %arg0, %c2_i32 : i32
    %31 = arith.extui %30 : i1 to i32
    %c0_i32_19 = arith.constant 0 : i32
    %32 = arith.cmpi ne, %31, %c0_i32_19 : i32
    scf.if %32 {
      %c0_20 = arith.constant 0 : index
      %c0_21 = arith.constant 0 : index
      %33 = memref.load %arg10[%c0_20, %c0_21] : memref<1x1xf32, #tpu.memory_space<smem>>
      %cst_22 = arith.constant 1.000000e+00 : f32
      %34 = arith.addf %cst_22, %33 : f32
      %c0_23 = arith.constant 0 : index
      %c0_24 = arith.constant 0 : index
      %35 = vector.load %arg17[%c0_23, %c0_24] : memref<24x128xf32, #tpu.memory_space<vmem>>, vector<24x128xf32>
      %36 = vector.broadcast %34 : f32 to vector<24x128xf32>
      %37 = arith.mulf %36, %35 : vector<24x128xf32>
      %c0_25 = arith.constant 0 : index
      %c0_26 = arith.constant 0 : index
      %38 = vector.load %arg18[%c0_25, %c0_26] : memref<24x128xf32, #tpu.memory_space<vmem>>, vector<24x128xf32>
      %39 = arith.addf %37, %38 : vector<24x128xf32>
      %c0_27 = arith.constant 0 : index
      %c0_28 = arith.constant 0 : index
      %40 = vector.load %arg11[%c0_27, %c0_28] : memref<128x128xf32, #tpu.memory_space<vmem>>, vector<128x128xf32>
      %cst_29 = arith.constant dense<0.000000e+00> : vector<24x128xf32>
      %41 = tpu.matmul %39, %40, %cst_29 {dimension_numbers = #tpu.dot_dimension_numbers<[1], [0], [0], [1], [0, 0, 1, 1], [], []>} : vector<24x128xf32>, vector<128x128xf32>, vector<24x128xf32> -> vector<24x128xf32>
      %c0_30 = arith.constant 0 : index
      %c0_31 = arith.constant 0 : index
      %42 = vector.load %arg12[%c0_30, %c0_31] : memref<1x128xf32, #tpu.memory_space<vmem>>, vector<1x128xf32>
      %43 = vector.broadcast %42 : vector<1x128xf32> to vector<24x128xf32>
      %44 = arith.addf %41, %43 : vector<24x128xf32>
      %cst_32 = arith.constant 0.000000e+00 : f32
      %45 = vector.broadcast %cst_32 : f32 to vector<24x128xf32>
      %46 = arith.cmpf ogt, %44, %45 : vector<24x128xf32>
      %cst_33 = arith.constant 1.000000e-01 : f32
      %47 = vector.broadcast %cst_33 : f32 to vector<24x128xf32>
      %48 = arith.mulf %47, %44 : vector<24x128xf32>
      %49 = arith.select %46, %44, %48 : vector<24x128xi1>, vector<24x128xf32>
      %c0_34 = arith.constant 0 : index
      %c0_35 = arith.constant 0 : index
      %50 = vector.load %arg13[%c0_34, %c0_35] : memref<128x128xf32, #tpu.memory_space<vmem>>, vector<128x128xf32>
      %cst_36 = arith.constant dense<0.000000e+00> : vector<24x128xf32>
      %51 = tpu.matmul %49, %50, %cst_36 {dimension_numbers = #tpu.dot_dimension_numbers<[1], [0], [0], [1], [0, 0, 1, 1], [], []>} : vector<24x128xf32>, vector<128x128xf32>, vector<24x128xf32> -> vector<24x128xf32>
      %c0_37 = arith.constant 0 : index
      %c0_38 = arith.constant 0 : index
      %52 = vector.load %arg14[%c0_37, %c0_38] : memref<1x128xf32, #tpu.memory_space<vmem>>, vector<1x128xf32>
      %53 = vector.broadcast %52 : vector<1x128xf32> to vector<24x128xf32>
      %54 = arith.addf %51, %53 : vector<24x128xf32>
      %cst_39 = arith.constant 0.000000e+00 : f32
      %55 = vector.broadcast %cst_39 : f32 to vector<24x128xf32>
      %56 = arith.maximumf %54, %55 : vector<24x128xf32>
      %c0_40 = arith.constant 0 : index
      %c0_41 = arith.constant 0 : index
      %57 = vector.load %arg15[%c0_40, %c0_41] : memref<24x128xf32, #tpu.memory_space<vmem>>, vector<24x128xf32>
      tpu.vector_store %arg15[%c0_40, %c0_41], %56 {strides = array<i32>} : memref<24x128xf32, #tpu.memory_space<vmem>>, vector<24x128xf32>,
    } else {
    }
    return
  }
  func.func @transform_0(%arg0: i32) -> (i32, i32) {
    %c0_i32 = arith.constant 0 : i32
    %c0_i32_0 = arith.constant 0 : i32
    %c0_i32_1 = arith.constant 0 : i32
    return %c0_i32, %c0_i32_0 : i32, i32
  }
  func.func @transform_1(%arg0: i32) -> (i32, i32) {
    %c0_i32 = arith.constant 0 : i32
    %c0_i32_0 = arith.constant 0 : i32
    %c0_i32_1 = arith.constant 0 : i32
    return %c0_i32, %c0_i32_0 : i32, i32
  }
  func.func @transform_2(%arg0: i32) -> (i32, i32) {
    %c0_i32 = arith.constant 0 : i32
    %c0_i32_0 = arith.constant 0 : i32
    return %arg0, %c0_i32 : i32, i32
  }
  func.func @transform_3(%arg0: i32) -> (i32, i32) {
    %c0_i32 = arith.constant 0 : i32
    %c0_i32_0 = arith.constant 0 : i32
    return %c0_i32, %arg0 : i32, i32
  }
  func.func @transform_4(%arg0: i32) -> (i32, i32) {
    %c0_i32 = arith.constant 0 : i32
    %c0_i32_0 = arith.constant 0 : i32
    return %arg0, %c0_i32 : i32, i32
  }
  func.func @transform_5(%arg0: i32) -> (i32, i32) {
    %c0_i32 = arith.constant 0 : i32
    %c0_i32_0 = arith.constant 0 : i32
    %c0_i32_1 = arith.constant 0 : i32
    return %c0_i32, %c0_i32_0 : i32, i32
  }
  func.func @transform_6(%arg0: i32) -> (i32, i32) {
    %c0_i32 = arith.constant 0 : i32
    %c0_i32_0 = arith.constant 0 : i32
    %c0_i32_1 = arith.constant 0 : i32
    return %c0_i32, %c0_i32_0 : i32, i32
  }
  func.func @transform_7(%arg0: i32) -> (i32, i32) {
    %c0_i32 = arith.constant 0 : i32
    %c0_i32_0 = arith.constant 0 : i32
    %c0_i32_1 = arith.constant 0 : i32
    return %c0_i32, %c0_i32_0 : i32, i32
  }
  func.func @transform_8(%arg0: i32) -> (i32, i32) {
    %c0_i32 = arith.constant 0 : i32
    %c0_i32_0 = arith.constant 0 : i32
    %c0_i32_1 = arith.constant 0 : i32
    return %c0_i32, %c0_i32_0 : i32, i32
  }
  func.func @transform_9(%arg0: i32) -> (i32, i32) {
    %c0_i32 = arith.constant 0 : i32
    %c0_i32_0 = arith.constant 0 : i32
    %c0_i32_1 = arith.constant 0 : i32
    return %c0_i32, %c0_i32_0 : i32, i32
  }
  func.func @transform_10(%arg0: i32) -> (i32, i32) {
    %c0_i32 = arith.constant 0 : i32
    %c0_i32_0 = arith.constant 0 : i32
    %c0_i32_1 = arith.constant 0 : i32
    return %c0_i32, %c0_i32_0 : i32, i32
  }
  func.func @transform_11(%arg0: i32) -> (i32, i32) {
    %c0_i32 = arith.constant 0 : i32
    %c0_i32_0 = arith.constant 0 : i32
    %c0_i32_1 = arith.constant 0 : i32
    return %c0_i32, %c0_i32_0 : i32, i32
  }
  func.func @transform_12(%arg0: i32) -> (i32, i32) {
    %c0_i32 = arith.constant 0 : i32
    %c0_i32_0 = arith.constant 0 : i32
    %c0_i32_1 = arith.constant 0 : i32
    return %c0_i32, %c0_i32_0 : i32, i32
  }
  func.func @transform_13(%arg0: i32) -> (i32, i32) {
    %c0_i32 = arith.constant 0 : i32
    %c0_i32_0 = arith.constant 0 : i32
    %c0_i32_1 = arith.constant 0 : i32
    return %c0_i32, %c0_i32_0 : i32, i32
  }
  func.func @transform_14(%arg0: i32) -> (i32, i32) {
    %c0_i32 = arith.constant 0 : i32
    %c0_i32_0 = arith.constant 0 : i32
    %c0_i32_1 = arith.constant 0 : i32
    return %c0_i32, %c0_i32_0 : i32, i32
  }
  func.func @transform_15(%arg0: i32) -> (i32, i32) {
    %c0_i32 = arith.constant 0 : i32
    %c0_i32_0 = arith.constant 0 : i32
    %c0_i32_1 = arith.constant 0 : i32
    return %c0_i32, %c0_i32_0 : i32, i32
  }
}

</mosaic_0001>

<bundles_post_ra>
// kernel: tpu_custom_call.1
= control target key start
LH: loop header
LB: loop body
LE: loop exit
PB: predicated region body
PF: predicated region fallthrough
CT: control target
= control target key end

     0   :  { %s4022_s0 = inlined_call_operand.hbm [shape: s32[24,1], index: 0, kind: input, shape index: {}]   ;;  %s4023_s1 = inlined_call_operand.hbm [shape: s32[1,24], index: 1, kind: input, shape index: {}]   ;;  %s4024_s2 = inlined_call_operand.hbm [shape: s32[384,1], index: 2, kind: input, shape index: {}]   ;;  %s4025_s3 = inlined_call_operand.hbm [shape: s32[1,384], index: 3, kind: input, shape index: {}]   ;;  %s4026_s4 = inlined_call_operand.hbm [shape: f32[384,8], index: 4, kind: input, shape index: {}]   ;;  %s4027_s5 = inlined_call_operand.hbm [shape: f32[24,128], index: 5, kind: input, shape index: {}]   ;;  %s4028_s6 = inlined_call_operand.hbm [shape: f32[8,128], index: 6, kind: input, shape index: {}]   ;;  %s4029_s7 = inlined_call_operand.hbm [shape: f32[8,128], index: 7, kind: input, shape index: {}]   ;;  %s4030_s8 = inlined_call_operand.hbm [shape: f32[1,128], index: 8, kind: input, shape index: {}]   ;;  %s4031_s9 = inlined_call_operand.<no memory space> [shape: f32[1,1], index: 9, kind: input, shape index: {}]   ;;  %s4032_s10 = inlined_call_operand.hbm [shape: f32[128,128], index: 10, kind: input, shape index: {}]   ;;  %s4033_s11 = inlined_call_operand.hbm [shape: f32[1,128], index: 11, kind: input, shape index: {}]   ;;  %s4034_s12 = inlined_call_operand.hbm [shape: f32[128,128], index: 12, kind: input, shape index: {}]   ;;  %s4035_s13 = inlined_call_operand.hbm [shape: f32[1,128], index: 13, kind: input, shape index: {}]   ;;  %s4036_s14 = inlined_call_operand.hbm [shape: f32[24,128], index: 14, kind: output, shape index: {0}]   ;;  %s4037_s15 = inlined_call_operand.hbm [shape: f32[8,128], index: 15, kind: output, shape index: {1}]  }
   0x1   :  { %4072 = sst [smem:[#allocation45_spill]] %s4022_s0 }
   0x2   :  { %4073 = sst [smem:[#allocation46_spill]] %s4023_s1 }
   0x3   :  { %4074 = sst [smem:[#allocation47_spill]] %s4024_s2 }
   0x4   :  { %4075 = sst [smem:[#allocation48_spill]] %s4025_s3 }
   0x5   :  { %4076 = sst [smem:[#allocation49_spill]] %s4026_s4 }
   0x6   :  { %4077 = sst [smem:[#allocation50_spill]] %s4027_s5 }
   0x7   :  { %4078 = sst [smem:[#allocation51_spill]] %s4028_s6 }
   0x8   :  { %4079 = sst [smem:[#allocation52_spill]] %s4035_s13 }
   0x9   :  { %4080 = sst [smem:[#allocation53_spill]] %s4036_s14 }
   0xa   :  { %4081 = sst [smem:[#allocation54_spill]] %s4037_s15 }
   0xb   :  { %21 = sst [smem:[#allocation4]] %s4031_s9 }
   0xc   :  { %22 = vsyncpa [#allocation6], 0 }
   0xd   :  { %23 = vsyncpa [#allocation9], 0 }
   0xe   :  { %24 = vsyncpa [#allocation15], 0 }
   0xf   :  { %25 = vsyncpa [#allocation18], 0 }
  0x10   :  { %26 = vsyncpa [#allocation21], 0 }
  0x11   :  { %27 = vsyncpa [#allocation24], 0 }
  0x12   :  { %28 = vsyncpa [#allocation7], 0 }
  0x13   :  { %29 = vsyncpa [#allocation27], 0  ;;  %s3352_s20 = smov 0   ;;  %s3354_s21 = smov 0  }
  0x14   :  { %s3356_s22 = smov 0   ;;  %s3358_s23 = smov 0  }
  0x15 LB: > { %4082 = sst [smem:[#allocation38_spill]] %s3228_s21  ;;  %s3238_s9 = smov [#allocation5]   ;;  %s3236_s23 = sphi %s3358_s23, %s4144_s23   ;;  %s3232_s22 = sphi %s3356_s22, %s4148_s22   ;;  %s3228_s21 = sphi %s3354_s21, %s4147_s21   ;;  %s3224_s20 = sphi %s3352_s20, %s4145_s20  }
  0x16   : > { %s403_s24 = sshll.u32 %s3238_s9, 4  ;;  %s3373_s25 = sadd.s32 4294967295, %s3236_s23   ;;  %s404_s24 = int_to_ptr.vmem [resolvable:$true] %s403_s24 }
  0x17   : > { %4083 = sst [smem:[#allocation39_spill]] %s3373_s25  ;;  %p2024_p0 = scmp.ge.s32.totalorder %s3236_s23, 1 }
  0x18   : > { %p4039_p1 = scmp.eq.s32.totalorder %s3373_s25, 0  ;;  %p391_p2 = scmp.lt.s32.totalorder %s3236_s23, 4 }
  0x19   : > { %s3392_s28 = sadd.s32 1, %s3236_s23   ;;  %s4088_s0 = sld [smem:[#allocation45_spill]] }
  0x1a   : > { %p3379_p4 = pnand %p2024_p0, %p391_p2  ;;  %4087 = sst [smem:[#allocation41_spill]] %s3392_s28 }
  0x1c   : > { %s4084_s26 = scalar_select %p3379_p4, 1, 0 }
  0x1d   : > { %p2614_p5 = pneg %p3379_p4 }
  0x1e   : > { %4085 = sst [smem:[#allocation40_spill]] %s4084_s26 }
  0x1f   : > { %p3387_p6 = pnand %p2614_p5, %p4039_p1  ;;  %s2744_s16 = scalar_lea.hbm %s4088_s0, 384 }
  0x20   : > { %p2745_p7 = scmp.ne.s32.totalorder %s4088_s0, %s2744_s16  ;;  %p2751_p11 = scmp.lt.u32.totalorder %s2744_s16, %s4088_s0 }
  0x21   : > { %s4086_s27 = scalar_select %p3387_p6, 1, 0 }
  0x22   : > { %p3402_p8 = pneg %p3387_p6 }
  0x24   : > { %s4089_s19 = scalar_select %p3402_p8, 1, 0 }
  0x25   : > { %p2747_p9 = pnand %p3402_p8, %p2745_p7 }
  0x27   : > { %p2748_p10 = pneg %p2747_p9 }
  0x29   : > { %p2753_p12 = pnand %p2751_p11, %p2748_p10 }
  0x2b   : > { %2756 = shalt.err (!%p2753_p12)
}
  0x2c   : > { %s2757_s29 = scalar_lea.vmem %s404_s24, 384  ;;  %p2765_p5 = scmp.lt.s32.totalorder %s404_s24, %s404_s24 }
  0x2d   : > { %p2758_p13 = scmp.ne.s32.totalorder %s404_s24, %s2757_s29  ;;  %p2766_p3 = scmp.lt.s32.totalorder %s2757_s29, %s2757_s29 }
  0x2f   : > { %p2760_p0 = pnand %p2758_p13, %p3402_p8  ;;  %p2767_p1 = por %p2766_p3, %p2765_p5 }
  0x31   : > { %p2761_p2 = pneg %p2760_p0 }
  0x33   : > { %p2768_p4 = pnand %p2767_p1, %p2761_p2 }
  0x35   : > { %2771 = shalt.err (!%p2768_p4)
}
  0x36   : > { %s4044_s30 = smov 128   ;;  %s4046_s15 = smov 8  }
  0x37   : > { %2617 = dma.hbm_to_vmem [thread:$0]  (!%p3387_p6), %s4088_s0, 384, %s404_s24, [#allocation6], %s4044_s30, %s4044_s30, %s4046_s15  }
  0x38   : > { %s81_s18 = ssub.s32 %s3236_s23, %s3392_s28  ;;  %s84_s9 = sadd.s32 1, %s3232_s22 }
  0x39   : > { %p82_p1 = scmp.eq.s32.totalorder %s81_s18, 0  ;;  %p91_p3 = scmp.ne.s32.totalorder %s3232_s22, %s3228_s21 }
  0x3a   : > { %p92_p4 = scmp.eq.s32.totalorder %s3236_s23, 0  ;;  %p97_p7 = scmp.ne.s32.totalorder %s3228_s21, %s3224_s20 }
  0x3b   : > { %s3430_s29 = scalar_select %p82_p1, %s3232_s22, %s84_s9  }
  0x3c   : > { %p93_p9 = por %p92_p4, %p91_p3  ;;  %p4091_p10 = scmp.eq.s32.totalorder %s3373_s25, 0 }
  0x3d   : > { %4090 = sst [smem:[#allocation42_spill]] %s3430_s29  ;;  %p2665_p12 = scmp.lt.s32.totalorder %s3236_s23, 3 }
  0x3e   : > { %p3434_p11 = por %p4091_p10, %p97_p7  ;;  %s525_s26 = sand.u32 1, %s3236_s23  }
  0x3f   : > { %s4048_s13 = sand.u32 1, %s3232_s22   ;;  %s4049_s24 = sshll.u32 %s3236_s23, 11 }
  0x40   : > { %s4092_s14 = scalar_select %p3434_p11, 1, 0 }
  0x41   : > { %s3443_s16 = sshll.u32 %s4048_s13, 7  ;;  %s4095_s2 = sld [smem:[#allocation47_spill]] }
  0x42   : > { %4093 = sst [smem:[#allocation43_spill]] %s4092_s14  ;;  %s529_s9 = scalar_lea.vmem [#allocation10], %s3443_s16 }
  0x43   : > { %4094 = sst [smem:[#allocation44_spill]] %s3443_s16  ;;  %s536_s30 = sshll.u32 %s529_s9, 4  ;;  %s3458_s30 = int_to_ptr.vmem [resolvable:$true] %s536_s30 }
  0x44   : > { %p3454_p13 = pnand %p2665_p12, %p93_p9  ;;  %s3241_s13 = smov [#allocation8]  }
  0x45   : > { %s3460_s0 = sshll.u32 %s3241_s13, 4  ;;  %s3462_s29 = scalar_lea.sflag [#allocation6], %s525_s26  ;;  %s418_s0 = int_to_ptr.vmem [resolvable:$true] %s3460_s0 }
  0x46   : > { %s4096_s15 = scalar_select %p3454_p13, 1, 0 }
  0x47   : > { %s3451_s20 = scalar_lea.hbm %s4095_s2, %s4049_s24  ;;  %p3468_p2 = pneg %p3454_p13 }
  0x48   : > { %s2772_s17 = scalar_lea.hbm %s3451_s20, 2048  ;;  %s2777_s28 = scalar_lea.hbm %s4095_s2, 6144 }
  0x49   : > { %p2773_p0 = scmp.ne.s32.totalorder %s3451_s20, %s2772_s17  ;;  %p2778_p3 = scmp.lt.u32.totalorder %s3451_s20, %s4095_s2 }
  0x4a   : > { %s4097_s18 = scalar_select %p3468_p2, 1, 0 }
  0x4b   : > { %p2775_p5 = pnand %p3468_p2, %p2773_p0  ;;  %p2779_p4 = scmp.lt.u32.totalorder %s2777_s28, %s2772_s17 }
  0x4c   : > { %p2781_p9 = scmp.lt.u32.totalorder %s2772_s17, %s3451_s20 }
  0x4d   : > { %p2776_p1 = pneg %p2775_p5  ;;  %p2780_p7 = por %p2779_p4, %p2778_p3 }
  0x4f   : > { %p2782_p10 = por %p2781_p9, %p2780_p7 }
  0x51   : > { %p2783_p12 = pnand %p2782_p10, %p2776_p1 }
  0x53   : > { %2786 = shalt.err (!%p2783_p12)
}
  0x54   : > { %s2787_s26 = scalar_lea.vmem %s3458_s30, 2048  ;;  %s3242_s24 = smov [#allocation10]  }
  0x55   : > { %p2788_p0 = scmp.ne.s32.totalorder %s3458_s30, %s2787_s26  ;;  %s2792_s9 = sshll.u32 %s3242_s24, 4  ;;  %s2793_s9 = int_to_ptr.vmem [resolvable:$false] %s2792_s9 }
  0x56   : > { %s2794_s14 = scalar_lea.vmem %s2793_s9, 4096  ;;  %p2795_p6 = scmp.lt.s32.totalorder %s3458_s30, %s2793_s9 }
  0x57   : > { %p2790_p5 = pnand %p2788_p0, %p3468_p2  ;;  %p2796_p8 = scmp.lt.s32.totalorder %s2794_s14, %s2787_s26 }
  0x59   : > { %p2791_p11 = pneg %p2790_p5  ;;  %p2797_p3 = por %p2796_p8, %p2795_p6 }
  0x5b   : > { %p2798_p4 = pnand %p2797_p3, %p2791_p11 }
  0x5d   : > { %2801 = shalt.err (!%p2798_p4)
}
  0x5e   : > { %s4098_s28 = smov 8   ;;  %s4099_s17 = smov 128  }
  0x5f   : > { %2648 = dma.hbm_to_vmem [thread:$0]  (!%p3454_p13), %s3451_s20, 2048, %s3458_s30, %s3462_s29, %s4099_s17, %s4099_s17, %s4098_s28  }
  0x60   : > { %s4100_s1 = sld [smem:[#allocation46_spill]]  ;;  %p4101_p8 = scmp.ne.s32.totalorder %s4089_s19, 0 }
  0x66   : > { %s2802_s9 = scalar_lea.hbm %s4100_s1, 16 }
  0x67   : > { %p2803_p6 = scmp.ne.s32.totalorder %s4100_s1, %s2802_s9  ;;  %p2809_p7 = scmp.lt.u32.totalorder %s2802_s9, %s4100_s1 }
  0x69   : > { %p2805_p11 = pnand %p2803_p6, %p4101_p8 }
  0x6b   : > { %p2806_p1 = pneg %p2805_p11 }
  0x6d   : > { %p2811_p9 = pnand %p2809_p7, %p2806_p1 }
  0x6f   : > { %2814 = shalt.err (!%p2811_p9)
}
  0x70   : > { %s2815_s25 = scalar_lea.vmem %s418_s0, 16  ;;  %s2822_s30 = scalar_lea.vmem %s418_s0, 32 }
  0x71   : > { %p2816_p10 = scmp.ne.s32.totalorder %s418_s0, %s2815_s25  ;;  %p2823_p5 = scmp.lt.s32.totalorder %s418_s0, %s418_s0 }
  0x72   : > { %p2824_p3 = scmp.lt.s32.totalorder %s2822_s30, %s2815_s25 }
  0x73   : > { %p2818_p12 = pnand %p2816_p10, %p4101_p8 }
  0x74   : > { %p2825_p4 = por %p2824_p3, %p2823_p5 }
  0x75   : > { %p2819_p0 = pneg %p2818_p12 }
  0x77   : > { %p2826_p13 = pnand %p2825_p4, %p2819_p0 }
  0x79   : > { %2829 = shalt.err (!%p2826_p13)
}
  0x7a   : > { %p4102_p6 = scmp.ne.s32.totalorder %s4086_s27, 0  ;;  %s3243_s2 = smov [#allocation14]  }
  0x7b   : > { %s441_s21 = sshll.u32 %s3243_s2, 4  ;;  %s3244_s24 = smov [#allocation17]   ;;  %s442_s21 = int_to_ptr.vmem [resolvable:$true] %s441_s21 }
  0x7c   : > { %2620 = dma.hbm_to_vmem [thread:$0]  (!%p4102_p6), %s4100_s1, 16, %s418_s0, [#allocation9]  }
  0x7d   : > { %s463_s9 = sshll.u32 %s3244_s24, 4  ;;  %s4103_s6 = sld [smem:[#allocation51_spill]]  ;;  %s464_s9 = int_to_ptr.vmem [resolvable:$true] %s463_s9 }
  0x83   : > { %s2830_s16 = scalar_lea.hbm %s4103_s6, 128 }
  0x84   : > { %p2831_p13 = scmp.ne.s32.totalorder %s4103_s6, %s2830_s16  ;;  %p2837_p7 = scmp.lt.u32.totalorder %s2830_s16, %s4103_s6 }
  0x86   : > { %p2833_p11 = pnand %p2831_p13, %p4101_p8 }
  0x88   : > { %p2834_p1 = pneg %p2833_p11 }
  0x8a   : > { %p2839_p9 = pnand %p2837_p7, %p2834_p1 }
  0x8c   : > { %2842 = shalt.err (!%p2839_p9)
}
  0x8d   : > { %s2843_s0 = scalar_lea.vmem %s442_s21, 128  ;;  %p2851_p5 = scmp.lt.s32.totalorder %s442_s21, %s442_s21 }
  0x8e   : > { %p2844_p10 = scmp.ne.s32.totalorder %s442_s21, %s2843_s0  ;;  %p2852_p3 = scmp.lt.s32.totalorder %s2843_s0, %s2843_s0 }
  0x90   : > { %p2846_p12 = pnand %p2844_p10, %p4101_p8  ;;  %p2853_p4 = por %p2852_p3, %p2851_p5 }
  0x92   : > { %p2847_p0 = pneg %p2846_p12 }
  0x94   : > { %p2854_p2 = pnand %p2853_p4, %p2847_p0 }
  0x96   : > { %2857 = shalt.err (!%p2854_p2)
}
  0x97   : > { %2626 = dma.hbm_to_vmem [thread:$0]  (!%p4102_p6), %s4103_s6, 128, %s442_s21, [#allocation15]  }
  0x98   : > { %s2858_s24 = scalar_lea.hbm %s4030_s8, 16 }
  0x99   : > { %p2859_p13 = scmp.ne.s32.totalorder %s4030_s8, %s2858_s24  ;;  %p2865_p2 = scmp.lt.u32.totalorder %s2858_s24, %s4030_s8 }
  0x9b   : > { %p2861_p11 = pnand %p2859_p13, %p4101_p8 }
  0x9d   : > { %p2862_p1 = pneg %p2861_p11 }
  0x9f   : > { %p2867_p7 = pnand %p2865_p2, %p2862_p1 }
  0xa1   : > { %2870 = shalt.err (!%p2867_p7)
}
  0xa2   : > { %s2871_s20 = scalar_lea.vmem %s464_s9, 16  ;;  %s2878_s21 = scalar_lea.vmem %s464_s9, 32 }
  0xa3   : > { %p2872_p9 = scmp.ne.s32.totalorder %s464_s9, %s2871_s20  ;;  %p2879_p0 = scmp.lt.s32.totalorder %s464_s9, %s464_s9 }
  0xa4   : > { %p2880_p5 = scmp.lt.s32.totalorder %s2878_s21, %s2871_s20 }
  0xa5   : > { %p2874_p10 = pnand %p2872_p9, %p4101_p8 }
  0xa6   : > { %p2881_p3 = por %p2880_p5, %p2879_p0 }
  0xa7   : > { %p2875_p12 = pneg %p2874_p10 }
  0xa9   : > { %p2882_p4 = pnand %p2881_p3, %p2875_p12 }
  0xab   : > { %2885 = shalt.err (!%p2882_p4)
}
  0xac   : > { %2632 = dma.hbm_to_vmem [thread:$0]  (!%p4102_p6), %s4030_s8, 16, %s464_s9, [#allocation18]  }
  0xad   : > { %s3245_s2 = smov [#allocation20]   ;;  %s2039_s16 = sshll.u32 %s3236_s23, 4 }
  0xae   : > { %s490_s4 = sshll.u32 %s3245_s2, 4  ;;  %s2886_s14 = scalar_lea.hbm %s4033_s11, 16  ;;  %s491_s4 = int_to_ptr.vmem [resolvable:$true] %s490_s4 }
  0xaf   : > { %p2887_p13 = scmp.ne.s32.totalorder %s4033_s11, %s2886_s14  ;;  %p2893_p2 = scmp.lt.u32.totalorder %s2886_s14, %s4033_s11 }
  0xb1   : > { %p2889_p11 = pnand %p2887_p13, %p4101_p8 }
  0xb3   : > { %p2890_p1 = pneg %p2889_p11 }
  0xb5   : > { %p2895_p7 = pnand %p2893_p2, %p2890_p1 }
  0xb7   : > { %2898 = shalt.err (!%p2895_p7)
}
  0xb8   : > { %s2899_s9 = scalar_lea.vmem %s491_s4, 16  ;;  %s2906_s0 = scalar_lea.vmem %s491_s4, 32 }
  0xb9   : > { %p2900_p9 = scmp.ne.s32.totalorder %s491_s4, %s2899_s9  ;;  %p2907_p0 = scmp.lt.s32.totalorder %s491_s4, %s491_s4 }
  0xba   : > { %p2908_p5 = scmp.lt.s32.totalorder %s2906_s0, %s2899_s9 }
  0xbb   : > { %p2902_p10 = pnand %p2900_p9, %p4101_p8 }
  0xbc   : > { %p2909_p3 = por %p2908_p5, %p2907_p0 }
  0xbd   : > { %p2903_p12 = pneg %p2902_p10 }
  0xbf   : > { %p2910_p4 = pnand %p2909_p3, %p2903_p12 }
  0xc1   : > { %2913 = shalt.err (!%p2910_p4)
}
  0xc2   : > { %2638 = dma.hbm_to_vmem [thread:$0]  (!%p4102_p6), %s4033_s11, 16, %s491_s4, [#allocation21]  }
  0xc3   : > { %s4104_s3 = sld [smem:[#allocation48_spill]]  ;;  %s4105_s25 = sand.u32 1, %s3232_s22  }
  0xc4   : > { %s549_s30 = scalar_lea.vmem [#allocation11], %s4105_s25  ;;  %p4106_p11 = scmp.ne.s32.totalorder %s4097_s18, 0 }
  0xc5   : > { %s556_s20 = sshll.u32 %s549_s30, 4  ;;  %s557_s20 = int_to_ptr.vmem [resolvable:$true] %s556_s20 }
  0xc9   : > { %s3572_s14 = scalar_lea.hbm %s4104_s3, %s2039_s16  ;;  %s2919_s0 = scalar_lea.hbm %s4104_s3, 48 }
  0xca   : > { %s2914_s21 = scalar_lea.hbm %s3572_s14, 16  ;;  %p2920_p7 = scmp.lt.u32.totalorder %s3572_s14, %s4104_s3 }
  0xcb   : > { %p2915_p13 = scmp.ne.s32.totalorder %s3572_s14, %s2914_s21  ;;  %p2921_p9 = scmp.lt.u32.totalorder %s2919_s0, %s2914_s21 }
  0xcc   : > { %p2923_p12 = scmp.lt.u32.totalorder %s2914_s21, %s3572_s14 }
  0xcd   : > { %p2917_p1 = pnand %p2915_p13, %p4106_p11  ;;  %p2922_p10 = por %p2921_p9, %p2920_p7 }
  0xcf   : > { %p2918_p2 = pneg %p2917_p1  ;;  %p2924_p0 = por %p2923_p12, %p2922_p10 }
  0xd1   : > { %p2925_p5 = pnand %p2924_p0, %p2918_p2 }
  0xd3   : > { %2928 = shalt.err (!%p2925_p5)
}
  0xd4   : > { %s2929_s2 = scalar_lea.vmem %s557_s20, 16  ;;  %s3246_s24 = smov [#allocation11]  }
  0xd5   : > { %p2930_p3 = scmp.ne.s32.totalorder %s557_s20, %s2929_s2  ;;  %s2934_s26 = sshll.u32 %s3246_s24, 4  ;;  %s2935_s26 = int_to_ptr.vmem [resolvable:$false] %s2934_s26 }
  0xd6   : > { %s2936_s25 = scalar_lea.vmem %s2935_s26, 32  ;;  %p2937_p1 = scmp.lt.s32.totalorder %s557_s20, %s2935_s26 }
  0xd7   : > { %p2932_p4 = pnand %p2930_p3, %p4106_p11  ;;  %p2938_p6 = scmp.lt.s32.totalorder %s2936_s25, %s2929_s2 }
  0xd9   : > { %p2933_p13 = pneg %p2932_p4  ;;  %p2939_p8 = por %p2938_p6, %p2937_p1 }
  0xdb   : > { %p2940_p7 = pnand %p2939_p8, %p2933_p13 }
  0xdd   : > { %2943 = shalt.err (!%p2940_p7)
}
  0xde   : > { %p4107_p9 = scmp.ne.s32.totalorder %s4096_s15, 0  ;;  %s3247_s30 = smov [#allocation13]  }
  0xdf   : > { %s427_s21 = sshll.u32 %s3247_s30, 4  ;;  %s3248_s9 = smov [#allocation16]   ;;  %s428_s21 = int_to_ptr.vmem [resolvable:$true] %s427_s21 }
  0xe0   : > { %2651 = dma.hbm_to_vmem [thread:$0]  (!%p4107_p9), %s3572_s14, 16, %s557_s20, %s3462_s29  }
  0xe1   : > { %s452_s4 = sshll.u32 %s3248_s9, 4  ;;  %s4108_s5 = sld [smem:[#allocation50_spill]]  ;;  %s453_s4 = int_to_ptr.vmem [resolvable:$true] %s452_s4 }
  0xe2   : > { %p4109_p6 = scmp.ne.s32.totalorder %s4089_s19, 0 }
  0xe7   : > { %s2944_s16 = scalar_lea.hbm %s4108_s5, 384 }
  0xe8   : > { %p2945_p8 = scmp.ne.s32.totalorder %s4108_s5, %s2944_s16  ;;  %p2951_p12 = scmp.lt.u32.totalorder %s2944_s16, %s4108_s5 }
  0xea   : > { %p2947_p2 = pnand %p2945_p8, %p4109_p6 }
  0xec   : > { %p2948_p10 = pneg %p2947_p2 }
  0xee   : > { %p2953_p0 = pnand %p2951_p12, %p2948_p10 }
  0xf0   : > { %2956 = shalt.err (!%p2953_p0)
}
  0xf1   : > { %s2957_s14 = scalar_lea.vmem %s428_s21, 384  ;;  %p2965_p13 = scmp.lt.s32.totalorder %s428_s21, %s428_s21 }
  0xf2   : > { %p2958_p5 = scmp.ne.s32.totalorder %s428_s21, %s2957_s14  ;;  %p2966_p1 = scmp.lt.s32.totalorder %s2957_s14, %s2957_s14 }
  0xf4   : > { %p2960_p3 = pnand %p2958_p5, %p4109_p6  ;;  %p2967_p7 = por %p2966_p1, %p2965_p13 }
  0xf6   : > { %p2961_p4 = pneg %p2960_p3 }
  0xf8   : > { %p2968_p9 = pnand %p2967_p7, %p2961_p4 }
  0xfa   : > { %2971 = shalt.err (!%p2968_p9)
}
  0xfb   : > { %p4110_p8 = scmp.ne.s32.totalorder %s4086_s27, 0  ;;  %s2972_s13 = scalar_lea.hbm %s4029_s7, 128 }
  0xfc   : > { %p2973_p2 = scmp.ne.s32.totalorder %s4029_s7, %s2972_s13  ;;  %p2979_p12 = scmp.lt.u32.totalorder %s2972_s13, %s4029_s7 }
  0xfd   : > { %2623 = dma.hbm_to_vmem [thread:$0]  (!%p4110_p8), %s4108_s5, 384, %s428_s21, [#allocation9], %s4099_s17, %s4099_s17, %s4098_s28  }
  0xfe   : > { %p2975_p9 = pnand %p2973_p2, %p4109_p6 }
 0x100   : > { %p2976_p10 = pneg %p2975_p9 }
 0x102   : > { %p2981_p0 = pnand %p2979_p12, %p2976_p10 }
 0x104   : > { %2984 = shalt.err (!%p2981_p0)
}
 0x105   : > { %s2985_s25 = scalar_lea.vmem %s453_s4, 128  ;;  %p2993_p13 = scmp.lt.s32.totalorder %s453_s4, %s453_s4 }
 0x106   : > { %p2986_p5 = scmp.ne.s32.totalorder %s453_s4, %s2985_s25  ;;  %p2994_p1 = scmp.lt.s32.totalorder %s2985_s25, %s2985_s25 }
 0x108   : > { %p2988_p3 = pnand %p2986_p5, %p4109_p6  ;;  %p2995_p7 = por %p2994_p1, %p2993_p13 }
 0x10a   : > { %p2989_p4 = pneg %p2988_p3 }
 0x10c   : > { %p2996_p11 = pnand %p2995_p7, %p2989_p4 }
 0x10e   : > { %2999 = shalt.err (!%p2996_p11)
}
 0x10f   : > { %2629 = dma.hbm_to_vmem [thread:$0]  (!%p4110_p8), %s4029_s7, 128, %s453_s4, [#allocation15]  }
 0x110   : > { %s3249_s20 = smov [#allocation19]   ;;  %s3250_s9 = smov [#allocation22]  }
 0x111   : > { %s476_s30 = sshll.u32 %s3249_s20, 4  ;;  %s500_s0 = sshll.u32 %s3250_s9, 4  ;;  %s477_s30 = int_to_ptr.vmem [resolvable:$true] %s476_s30  ;;  %s501_s0 = int_to_ptr.vmem [resolvable:$true] %s500_s0 }
 0x112   : > { %s3000_s24 = scalar_lea.hbm %s4032_s10, 2048 }
 0x113   : > { %p3001_p11 = scmp.ne.s32.totalorder %s4032_s10, %s3000_s24  ;;  %p3007_p10 = scmp.lt.u32.totalorder %s3000_s24, %s4032_s10 }
 0x115   : > { %p3003_p2 = pnand %p3001_p11, %p4109_p6 }
 0x117   : > { %p3004_p9 = pneg %p3003_p2 }
 0x119   : > { %p3009_p12 = pnand %p3007_p10, %p3004_p9 }
 0x11b   : > { %3012 = shalt.err (!%p3009_p12)
}
 0x11c   : > { %s3013_s4 = scalar_lea.vmem %s477_s30, 2048  ;;  %p3021_p4 = scmp.lt.s32.totalorder %s477_s30, %s477_s30 }
 0x11d   : > { %p3014_p0 = scmp.ne.s32.totalorder %s477_s30, %s3013_s4  ;;  %p3022_p13 = scmp.lt.s32.totalorder %s3013_s4, %s3013_s4 }
 0x11f   : > { %p3016_p5 = pnand %p3014_p0, %p4109_p6  ;;  %p3023_p1 = por %p3022_p13, %p3021_p4 }
 0x121   : > { %p3017_p3 = pneg %p3016_p5 }
 0x123   : > { %p3024_p7 = pnand %p3023_p1, %p3017_p3 }
 0x125   : > { %3027 = shalt.err (!%p3024_p7)
}
 0x126   : > { %2635 = dma.hbm_to_vmem [thread:$0]  (!%p4110_p8), %s4032_s10, 2048, %s477_s30, [#allocation18], %s4099_s17, %s4099_s17, %s4098_s28  }
 0x127   : > { %s3028_s16 = scalar_lea.hbm %s4034_s12, 2048 }
 0x128   : > { %p3029_p11 = scmp.ne.s32.totalorder %s4034_s12, %s3028_s16  ;;  %p3035_p10 = scmp.lt.u32.totalorder %s3028_s16, %s4034_s12 }
 0x12a   : > { %p3031_p2 = pnand %p3029_p11, %p4109_p6 }
 0x12c   : > { %p3032_p9 = pneg %p3031_p2 }
 0x12e   : > { %p3037_p12 = pnand %p3035_p10, %p3032_p9 }
 0x130   : > { %3040 = shalt.err (!%p3037_p12)
}
 0x131   : > { %s3041_s21 = scalar_lea.vmem %s501_s0, 2048  ;;  %p3049_p4 = scmp.lt.s32.totalorder %s501_s0, %s501_s0 }
 0x132   : > { %p3042_p0 = scmp.ne.s32.totalorder %s501_s0, %s3041_s21  ;;  %p3050_p13 = scmp.lt.s32.totalorder %s3041_s21, %s3041_s21 }
 0x134   : > { %p3044_p5 = pnand %p3042_p0, %p4109_p6  ;;  %p3051_p1 = por %p3050_p13, %p3049_p4 }
 0x136   : > { %p3045_p3 = pneg %p3044_p5 }
 0x138   : > { %p3052_p7 = pnand %p3051_p1, %p3045_p3 }
 0x13a   : > { %3055 = shalt.err (!%p3052_p7)
}
 0x13b   : > { %2641 = dma.hbm_to_vmem [thread:$0]  (!%p4110_p8), %s4034_s12, 2048, %s501_s0, [#allocation21], %s4099_s17, %s4099_s17, %s4098_s28  }
 0x13c   : > { %s3251_s14 = smov [#allocation23]   ;;  %s4111_s9 = sshll.u32 %s3236_s23, 11 }
 0x13d   : > { %s514_s20 = sshll.u32 %s3251_s14, 4  ;;  %s4112_s24 = sld [smem:[#allocation49_spill]]  ;;  %s515_s20 = int_to_ptr.vmem [resolvable:$true] %s514_s20 }
 0x13e   : > { %s4113_s21 = sld [smem:[#allocation52_spill]] }
 0x143   : > { %s3680_s2 = scalar_lea.hbm %s4112_s24, %s4111_s9 }
 0x144   : > { %s4114_s1 = smov %s4113_s21  ;;  %s3056_s3 = scalar_lea.hbm %s4113_s21, 16 }
 0x145   : > { %p3057_p11 = scmp.ne.s32.totalorder %s4114_s1, %s3056_s3  ;;  %p3063_p10 = scmp.lt.u32.totalorder %s3056_s3, %s4114_s1 }
 0x147   : > { %p3059_p2 = pnand %p3057_p11, %p4109_p6 }
 0x149   : > { %p3060_p9 = pneg %p3059_p2 }
 0x14b   : > { %p3065_p12 = pnand %p3063_p10, %p3060_p9 }
 0x14d   : > { %3068 = shalt.err (!%p3065_p12)
}
 0x14e   : > { %s3069_s23 = scalar_lea.vmem %s515_s20, 16  ;;  %s3076_s4 = scalar_lea.vmem %s515_s20, 32 }
 0x14f   : > { %p3070_p0 = scmp.ne.s32.totalorder %s515_s20, %s3069_s23  ;;  %p3077_p4 = scmp.lt.s32.totalorder %s515_s20, %s515_s20 }
 0x150   : > { %p3078_p13 = scmp.lt.s32.totalorder %s3076_s4, %s3069_s23 }
 0x151   : > { %p3072_p5 = pnand %p3070_p0, %p4109_p6 }
 0x152   : > { %p3079_p1 = por %p3078_p13, %p3077_p4 }
 0x153   : > { %p3073_p3 = pneg %p3072_p5 }
 0x155   : > { %p3080_p7 = pnand %p3079_p1, %p3073_p3 }
 0x157   : > { %3083 = shalt.err (!%p3080_p7)
}
 0x158   : > { %s4115_s3 = sld [smem:[#allocation44_spill]]  ;;  %s3084_s9 = scalar_lea.hbm %s3680_s2, 2048 }
 0x159   : > { %2644 = dma.hbm_to_vmem [thread:$0]  (!%p4110_p8), %s4114_s1, 16, %s515_s20, [#allocation24]  }
 0x15a   : > { %p3085_p6 = scmp.ne.s32.totalorder %s3680_s2, %s3084_s9  ;;  %p4116_p11 = scmp.ne.s32.totalorder %s4097_s18, 0 }
 0x15b   : > { %s3089_s16 = scalar_lea.hbm %s4112_s24, 6144  ;;  %p3090_p10 = scmp.lt.u32.totalorder %s3680_s2, %s4112_s24 }
 0x15c   : > { %p3087_p2 = pnand %p3085_p6, %p4116_p11  ;;  %p3091_p12 = scmp.lt.u32.totalorder %s3089_s16, %s3084_s9 }
 0x15d   : > { %p3093_p8 = scmp.lt.u32.totalorder %s3084_s9, %s3680_s2 }
 0x15e   : > { %s567_s19 = scalar_lea.vmem [#allocation12], %s4115_s3  ;;  %p3088_p9 = pneg %p3087_p2 }
 0x15f   : > { %s574_s14 = sshll.u32 %s567_s19, 4  ;;  %p3092_p0 = por %p3091_p12, %p3090_p10  ;;  %s3701_s14 = int_to_ptr.vmem [resolvable:$true] %s574_s14 }
 0x161   : > { %p3094_p5 = por %p3093_p8, %p3092_p0 }
 0x163   : > { %p3095_p3 = pnand %p3094_p5, %p3088_p9 }
 0x165   : > { %3098 = shalt.err (!%p3095_p3)
}
 0x166   : > { %s3099_s20 = scalar_lea.vmem %s3701_s14, 2048  ;;  %s3252_s21 = smov [#allocation12]  }
 0x167   : > { %p3100_p4 = scmp.ne.s32.totalorder %s3701_s14, %s3099_s20  ;;  %s3104_s0 = sshll.u32 %s3252_s21, 4  ;;  %s3105_s0 = int_to_ptr.vmem [resolvable:$false] %s3104_s0 }
 0x168   : > { %s3106_s30 = scalar_lea.vmem %s3105_s0, 4096  ;;  %p3107_p7 = scmp.lt.s32.totalorder %s3701_s14, %s3105_s0 }
 0x169   : > { %p3102_p13 = pnand %p3100_p4, %p4116_p11  ;;  %p3108_p6 = scmp.lt.s32.totalorder %s3106_s30, %s3099_s20 }
 0x16b   : > { %p3103_p1 = pneg %p3102_p13  ;;  %p3109_p2 = por %p3108_p6, %p3107_p7 }
 0x16d   : > { %p3110_p10 = pnand %p3109_p2, %p3103_p1 }
 0x16f   : > { %3113 = shalt.err (!%p3110_p10)
}
 0x170   : > { %p4117_p9 = scmp.ne.s32.totalorder %s4096_s15, 0  ;;  %s4118_s18 = sld [smem:[#allocation40_spill]] }
 0x172   : > { %2654 = dma.hbm_to_vmem [thread:$0]  (!%p4117_p9), %s3680_s2, 2048, %s3701_s14, %s3462_s29, %s4099_s17, %s4099_s17, %s4098_s28  }
 0x176   : > { %p4119_p11 = scmp.ne.s32.totalorder %s4118_s18, 0 }
 0x177   : > { %s4120_s23 = sld [smem:[#allocation39_spill]] (!%p4119_p11) }
 0x178   : > { %586 = sbr.rel (%p4119_p11) target bundleno = 2105 (0x839), region = 76 }
 0x17d   : > { %p4121_p12 = scmp.eq.s32.totalorder (!%p4119_p11), %s4120_s23, 0 }
 0x17f   : > { %3183 = dma.done.wait (%p4121_p12), [#allocation6], 384   ;;  %p4122_p0 = pmov %p4121_p12 }
 0x181   : > { %3185 = vsyncadd (%p4122_p0), [#allocation6], 4294966912  ;;  %p4123_p8 = pmov %p4122_p0 }
 0x182   : > { %p4124_p5 = pmov %p4122_p0 }
 0x183   : > { %3187 = dma.done.wait (%p4123_p8), [#allocation9], 16  }
 0x184   : > { %3189 = vsyncadd (%p4124_p5), [#allocation9], 4294967280  ;;  %s4125_s15 = sld [smem:[#allocation38_spill]]  ;;  %s4126_s4 = sld [smem:[#allocation43_spill]] }
 0x185   : > { %s596_s5 = sand.u32 1, %s4120_s23  }
 0x186   : > { %s597_s17 = scalar_lea.sflag [#allocation6], %s596_s5 }
 0x18a   : > { %s598_s29 = sand.u32 1, %s4125_s15   ;;  %p4127_p3 = scmp.ne.s32.totalorder %s4126_s4, 0 }
 0x18b   : > { %s2046_s28 = sshll.u32 %s598_s29, 7 }
 0x18c   : > { %s3740_s2 = scalar_lea.vmem [#allocation10], %s2046_s28 }
 0x18d   : > { %3191 = dma.done.wait (%p4127_p3), %s597_s17, 4112  }
 0x18e   : > { %3193 = vsyncadd (%p4127_p3), %s597_s17, 4294963184  ;;  %s3746_s6 = scalar_lea.vmem [#allocation11], %s598_s29  ;;  %s3748_s3 = scalar_lea.vmem [#allocation12], %s2046_s28 }
 0x18f   : > { %p4128_p4 = pmov %p4122_p0 }
 0x190   : > { %p4129_p13 = pmov %p4122_p0 }
 0x191   : > { %3195 = dma.done.wait (%p4128_p4), [#allocation9], 384  }
 0x192   : > { %3197 = vsyncadd (%p4129_p13), [#allocation9], 4294966912  ;;  %p4130_p1 = pmov %p4122_p0 }
 0x193   : > { %p4131_p7 = pmov %p4122_p0 }
 0x194   : > { %3199 = dma.done.wait (%p4130_p1), [#allocation15], 256  }
 0x195   : > { %3201 = vsyncadd (%p4131_p7), [#allocation15], 4294967040  ;;  %p4132_p6 = pmov %p4122_p0 }
 0x196   : > { %p4133_p2 = pmov %p4122_p0 }
 0x197   : > { %3203 = dma.done.wait (%p4132_p6), [#allocation18], 2064  }
 0x198   : > { %3205 = vsyncadd (%p4133_p2), [#allocation18], 4294965232  ;;  %p4134_p10 = pmov %p4122_p0 }
 0x199   : > { %p4135_p9 = pmov %p4122_p0 }
 0x19a   : > { %3207 = dma.done.wait (%p4134_p10), [#allocation21], 2064  }
 0x19b   : > { %3209 = vsyncadd (%p4135_p9), [#allocation21], 4294965232  ;;  %p4136_p11 = pmov %p4122_p0 }
 0x19c   : > { %p4137_p12 = pmov %p4122_p0 }
 0x19d   : > { %3211 = dma.done.wait (%p4136_p11), [#allocation24], 16  }
 0x19e   : > { %3213 = vsyncadd (%p4137_p12), [#allocation24], 4294967280  ;;  %p4138_p0 = scmp.ne.s32.totalorder %s4120_s23, 0 }
 0x19f   : > { %v706_v0 = vld [vmem:[#allocation5] sm:$0xff] (!%p4138_p0)  ;;  %v708_v1 = vld [vmem:[#allocation5 + $0x10] sm:$0xff] (!%p4138_p0)  ;;  %v3253_v2 = vmov (!%p4138_p0), 0   ;;  %v3254_v3 = vmov (!%p4138_p0), 0.0   ;;  %v707_v5 = vld [vmem:[#allocation5 + $0x8] sm:$0xff] (!%p4138_p0)  ;;  %vm3255_vm0 = vmmov (!%p4138_p0), 0   ;;  %v709_v6 = vlaneseq (!%p4138_p0) }
 0x1a0   : > { %705 = sbr.rel (%p4138_p0) target bundleno = 987 (0x3db), region = 132  ;;  %2740 = vset.pattern.permute.xlu0 (!%p4138_p0), %v3253_v2  ;;  %2741 = vset.pattern.permute.xlu1 (!%p4138_p0), %v3253_v2  ;;  %829 = vst [vmem:[#allocation3] sm:$0xff] (!%p4138_p0), %v3254_v3  ;;  %830 = vst [vmem:[#allocation3 + $0x8] sm:$0xff] (!%p4138_p0), %v3254_v3  ;;  %v732_v4 = vld [vmem:[#allocation14] sm:$0xff] (!%p4138_p0)  ;;  %vm733_vm1 = vcmask (!%p4138_p0), 64512   ;;  %v3256_v14 = vmov (!%p4138_p0), 0.0|0.0  }
 0x1a1   : > { %831 = vst [vmem:[#allocation3 + $0x10] sm:$0xff] (!%p4138_p0), %v3254_v3  ;;  %712 = vperm.xlu0 (!%p4138_p0), %2740, %v706_v0   ;;  %718 = vperm.xlu1 (!%p4138_p0), %2741, %v708_v1   ;;  %v710_v7 = vand.u32 (!%p4138_p0), 127, %v709_v6  ;;  %v729_v15 = vld [vmem:[#allocation13] sm:$0xff] (!%p4138_p0)  ;;  %v730_v19 = vld [vmem:[#allocation13 + $0x8] sm:$0xff] (!%p4138_p0)  ;;  %v834_v21 = vshrl.u32 (!%p4138_p0), %v709_v6, 7  ;;  %v731_v25 = vld [vmem:[#allocation13 + $0x10] sm:$0xff] (!%p4138_p0) }
 0x1a2   : > { %2234 = vmatprep.subr.mxu0 (!%p4138_p0), %v3254_v3  ;;  %2236 = vmatprep.mubr.msk.f32.mxu0 (!%p4138_p0), %vm3255_vm0, %v3254_v3  ;;  %v2063_v24 = vld [vmem:[#allocation8] ss:$0 sm:$0xff] (!%p4138_p0)  ;;  %vm843_vm6 = vcmask (!%p4138_p0), 195584  }
 0x1a3   : > { %2235 = vmatpush3.msra.mxu0 (!%p4138_p0), %v732_v4  ;;  %2251 = vmatprep.mubr.msk.f32.mxu1 (!%p4138_p0), %vm3255_vm0, %v3254_v3  ;;  %vm839_vm5 = vcmp.eq.s32.totalorder (!%p4138_p0), %v834_v21, %v2063_v24 }
 0x1a4   : > { %2433 = vmatprep.subr.bf16.mxu1 (!%p4138_p0), %v3256_v14  ;;  %v2064_v30 = vsel (!%p4138_p0), %vm839_vm5, 1.0, %v3254_v3 }
 0x1a5   : > { %715 = vperm.xlu0 (!%p4138_p0), %2740, %v707_v5  }
 0x220   : > { %v713_v8 = vpop.permute.xlu0 %712  ;;  %v719_v10 = vpop.permute.xlu1 %718 }
 0x221   : > { %vm720_vm2 = vcmp.eq.s32.totalorder %v713_v8, %v710_v7  ;;  %vm722_vm4 = vcmp.eq.s32.totalorder %v719_v10, %v710_v7 }
 0x222   : > { %v2057_v9 = vsel %vm720_vm2, 1.0, %v3254_v3  ;;  %v2059_v13 = vsel %vm722_vm4, 1.0, %v3254_v3 }
 0x223   : > { %2237 = vmatmul.mubr.msk.f32.vlgmr.msra.gmra.mrb[0].mxu0 %vm733_vm1, %v2057_v9 }
 0x224   : > { %v716_v11 = vpop.permute.xlu0 %715  ;;  %2239 = vmatprep.mubr.msk.f32.mxu0 %vm3255_vm0, %v3254_v3 }
 0x225   : > { %vm721_vm3 = vcmp.eq.s32.totalorder %v716_v11, %v710_v7 }
 0x226   : > { %v2058_v12 = vsel %vm721_vm3, 1.0, %v3254_v3 }
 0x227   : > { %2240 = vmatmul.mubr.msk.f32.gmra.mrb[2].mxu0 %vm733_vm1, %v2058_v12 }
 0x228   : > { %2242 = vmatprep.mubr.msk.f32.mxu0 %vm3255_vm0, %v3254_v3 }
 0x22b   : > { %2243 = vmatmul.mubr.msk.f32.gmra.mrb[4].mxu0 %vm733_vm1, %v2059_v13 }
 0x2f6   : > { %v809_v16 = vpop.f32.mrb[0].mxu0 }
 0x2f7   : > { %v823_v17 = vadd.f32 %v809_v16, %v729_v15  ;;  %v2238_v18 = vpop.f32.mrb[1].mxu0 }
 0x2f9   : > { %826 = vst [vmem:[#allocation2] sm:$0xff] %v823_v17 }
 0x2fa   : > { %v814_v20 = vpop.f32.mrb[2].mxu0 }
 0x2fb   : > { %v824_v22 = vadd.f32 %v814_v20, %v730_v19  ;;  %v2241_v23 = vpop.f32.mrb[3].mxu0 }
 0x2fd   : > { %827 = vst [vmem:[#allocation2 + $0x8] sm:$0xff] %v824_v22  ;;  %v2434_v26 = vpack.c.bf16 %v824_v22, %v823_v17 }
 0x2fe   : > { %v819_v27 = vpop.f32.mrb[4].mxu0 }
 0x2ff   : > { %v825_v28 = vadd.f32 %v819_v27, %v731_v25  ;;  %2435 = vmatpush3.bf16.msra.mxu1 %v2434_v26  ;;  %v2244_v29 = vpop.f32.mrb[5].mxu0 }
 0x300   : > { %2249 = vmatprep.subr.mxu1 %v3254_v3 }
 0x301   : > { %828 = vst [vmem:[#allocation2 + $0x10] sm:$0xff] %v825_v28 }
 0x303   : > { %2250 = vmatpush3.msra.mxu1 %v825_v28 }
 0x304   : > { %2252 = vmatmul.mubr.msk.f32.vlgmr.msra.gmra.mrb[0].mxu1 %vm843_vm6, %v2064_v30 }
 0x3d7   : > { %v913_v31 = vpop.f32.mrb[0].mxu1 }
 0x3d8   : > { %v914_v32 = vadd.f32 %v913_v31, %v732_v4  ;;  %v2253_v33 = vpop.f32.mrb[1].mxu1 }
 0x3da   : > { %917 = vst [vmem:[#allocation26] sm:$0xff] %v914_v32 }
 0x3db PF: > { %v920_v34 = vld [vmem:[%s3740_s2 + $0x10] sm:$0xff]  ;;  %v918_v35 = vld [vmem:[%s3740_s2] sm:$0xff]  ;;  %v3257_v36 = vmov 0   ;;  %v921_v37 = vld [vmem:[%s3740_s2 + $0x18] sm:$0xff]  ;;  %vm1060_vm7 = vcmask 64512   ;;  %v935_v8 = vlaneseq  ;;  %vm1254_vm8 = vcmask 195584  }
 0x3dc   : > { %2743 = vset.pattern.permute.xlu1 %v3257_v36  ;;  %2742 = vset.pattern.permute.xlu0 %v3257_v36  ;;  %v919_v38 = vld [vmem:[%s3740_s2 + $0x8] sm:$0xff]  ;;  %v1033_v39 = vld [vmem:[#allocation2] sm:$0xff]  ;;  %v1034_v40 = vld [vmem:[#allocation2 + $0x8] sm:$0xff]  ;;  %v3258_v12 = vmov 0.0   ;;  %s4139_s19 = sld [smem:[#allocation39_spill]] }
 0x3dd   : > { %944 = vperm.xlu1 %2743, %v920_v34   ;;  %938 = vperm.xlu0 %2742, %v918_v35   ;;  %v2436_v41 = vpack.c.bf16 %v1034_v40, %v1033_v39  ;;  %v1052_v42 = vld [vmem:[#allocation16] sm:$0xff]  ;;  %v1037_v44 = vld [vmem:[%s3748_s3 + $0x8] sm:$0xff]  ;;  %v1038_v48 = vld [vmem:[%s3748_s3 + $0x10] sm:$0xff]  ;;  %v3825_v9 = vand.u32 127, %v935_v8 }
 0x3de   : > { %v1036_v43 = vld [vmem:[%s3748_s3] sm:$0xff]  ;;  %2254 = vmatprep.subr.mxu1 %v1052_v42  ;;  %v1039_v49 = vld [vmem:[%s3748_s3 + $0x18] sm:$0xff]  ;;  %v924_v51 = vld [vmem:[%s3740_s2 + $0x30] sm:$0xff] }
 0x3df   : > { %v923_v45 = vld [vmem:[%s3740_s2 + $0x28] sm:$0xff]  ;;  %v922_v46 = vld [vmem:[%s3740_s2 + $0x20] sm:$0xff]  ;;  %2256 = vmatprep.mubr.msk.f32.mxu1 %vm1060_vm7, %v1036_v43  ;;  %2437 = vmatprep.subr.bf16.mxu0 %v2436_v41  ;;  %v925_v50 = vld [vmem:[%s3740_s2 + $0x38] sm:$0xff] }
 0x3e0   : > { %2255 = vmatpush3.msra.mxu1 %v1052_v42  ;;  %v1035_v47 = vld [vmem:[#allocation2 + $0x10] sm:$0xff]  ;;  %2439 = vmatpush3.bf16.msra.mxu0 %v2436_v41  ;;  %v1042_v56 = vld [vmem:[%s3748_s3 + $0x30] sm:$0xff]  ;;  %v1043_v57 = vld [vmem:[%s3748_s3 + $0x38] sm:$0xff] }
 0x3e1   : > { %947 = vperm.xlu1 %2743, %v921_v37   ;;  %941 = vperm.xlu0 %2742, %v919_v38   ;;  %v1040_v52 = vld [vmem:[%s3748_s3 + $0x20] sm:$0xff]  ;;  %v1041_v53 = vld [vmem:[%s3748_s3 + $0x28] sm:$0xff]  ;;  %v929_v58 = vld [vmem:[%s3740_s2 + $0x58] sm:$0xff] }
 0x3e2   : > { %2257 = vmatmul.mubr.msk.f32.vlgmr.msra.gmra.mrb[0].mxu1 %vm1060_vm7, %v1037_v44  ;;  %2284 = vmatprep.subr.mxu0 %v1035_v47  ;;  %v927_v54 = vld [vmem:[%s3740_s2 + $0x48] sm:$0xff]  ;;  %v926_v55 = vld [vmem:[%s3740_s2 + $0x40] sm:$0xff]  ;;  %v928_v59 = vld [vmem:[%s3740_s2 + $0x50] sm:$0xff]  ;;  %p2122_p8 = scmp.ne.s32.totalorder %s4139_s19, 2 }
 0x3e3   : > { %2259 = vmatprep.mubr.msk.f32.mxu1 %vm1060_vm7, %v1038_v48  ;;  %v1044_v60 = vld [vmem:[%s3748_s3 + $0x40] sm:$0xff]  ;;  %v1045_v61 = vld [vmem:[%s3748_s3 + $0x48] sm:$0xff]  ;;  %v1046_v0 = vld [vmem:[%s3748_s3 + $0x50] sm:$0xff]  ;;  %s3941_s14 = sld [smem:[#allocation4]] (!%p2122_p8) }
 0x3e4   : > { %2285 = vmatpush3.msra.mxu0 %v1035_v47  ;;  %v931_v62 = vld [vmem:[%s3740_s2 + $0x68] sm:$0xff]  ;;  %v930_v63 = vld [vmem:[%s3740_s2 + $0x60] sm:$0xff]  ;;  %v933_v2 = vld [vmem:[%s3740_s2 + $0x78] sm:$0xff]  ;;  %v3259_v47 = vmov 0.0|0.0  }
 0x3e5   : > { %953 = vperm.xlu1 %2743, %v923_v45   ;;  %950 = vperm.xlu0 %2742, %v922_v46   ;;  %v1047_v1 = vld [vmem:[%s3748_s3 + $0x58] sm:$0xff]  ;;  %v932_v3 = vld [vmem:[%s3740_s2 + $0x70] sm:$0xff]  ;;  %v1048_v4 = vld [vmem:[%s3748_s3 + $0x60] sm:$0xff] }
 0x3e6   : > { %2260 = vmatmul.mubr.msk.f32.gmra.mrb[2].mxu1 %vm1060_vm7, %v1039_v49  ;;  %v1049_v5 = vld [vmem:[%s3748_s3 + $0x68] sm:$0xff]  ;;  %v1050_v6 = vld [vmem:[%s3748_s3 + $0x70] sm:$0xff]  ;;  %v1051_v7 = vld [vmem:[%s3748_s3 + $0x78] sm:$0xff]  ;;  %2440 = vmatprep.subr.bf16.mxu0 %v3259_v47 }
 0x3e7   : > { %2262 = vmatprep.mubr.msk.f32.mxu1 %vm1060_vm7, %v1040_v52  ;;  %2512 = vmatprep.subr.bf16.mxu1 %v3259_v47 }
 0x3e9   : > { %959 = vperm.xlu1 %2743, %v925_v50   ;;  %956 = vperm.xlu0 %2742, %v924_v51   ;;  %s1575_s9 = sadd.f32 (!%p2122_p8), 1.0, %s3941_s14 }
 0x3ea   : > { %2263 = vmatmul.mubr.msk.f32.gmra.mrb[4].mxu1 %vm1060_vm7, %v1041_v53 }
 0x3eb   : > { %2265 = vmatprep.mubr.msk.f32.mxu1 %vm1060_vm7, %v1042_v56 }
 0x3ed   : > { %965 = vperm.xlu1 %2743, %v927_v54   ;;  %962 = vperm.xlu0 %2742, %v926_v55  }
 0x3ee   : > { %2266 = vmatmul.mubr.msk.f32.gmra.mrb[6].mxu1 %vm1060_vm7, %v1043_v57 }
 0x3ef   : > { %2268 = vmatprep.mubr.msk.f32.mxu1 %vm1060_vm7, %v1044_v60  ;;  %v3891_v60 = vld [vmem:[#allocation17] ss:$0 sm:$0xff] }
 0x3f1   : > { %971 = vperm.xlu1 %2743, %v929_v58   ;;  %968 = vperm.xlu0 %2742, %v928_v59  }
 0x3f2   : > { %2269 = vmatmul.mubr.msk.f32.gmra.mrb[8].mxu1 %vm1060_vm7, %v1045_v61 }
 0x3f3   : > { %2271 = vmatprep.mubr.msk.f32.mxu1 %vm1060_vm7, %v1046_v0 }
 0x3f5   : > { %977 = vperm.xlu1 %2743, %v931_v62   ;;  %974 = vperm.xlu0 %2742, %v930_v63  }
 0x3f6   : > { %2272 = vmatmul.mubr.msk.f32.gmra.mrb[10].mxu1 %vm1060_vm7, %v1047_v1 }
 0x3f7   : > { %2274 = vmatprep.mubr.msk.f32.mxu1 %vm1060_vm7, %v1048_v4 }
 0x3f9   : > { %983 = vperm.xlu1 %2743, %v933_v2   ;;  %980 = vperm.xlu0 %2742, %v932_v3  }
 0x3fa   : > { %2275 = vmatmul.mubr.msk.f32.gmra.mrb[12].mxu1 %vm1060_vm7, %v1049_v5 }
 0x3fb   : > { %2277 = vmatprep.mubr.msk.f32.mxu1 %vm1060_vm7, %v1050_v6 }
 0x3fe   : > { %2278 = vmatmul.mubr.msk.f32.gmra.mrb[14].mxu1 %vm1060_vm7, %v1051_v7 }
 0x45c   : > { %v945_v10 = vpop.permute.xlu1 %944  ;;  %v939_v11 = vpop.permute.xlu0 %938 }
 0x45d   : > { %vm985_vm9 = vcmp.eq.s32.totalorder %v939_v11, %v3825_v9  ;;  %vm987_vm10 = vcmp.eq.s32.totalorder %v945_v10, %v3825_v9 }
 0x45e   : > { %v2066_v13 = vsel %vm985_vm9, 1.0, %v3258_v12  ;;  %v2068_v16 = vsel %vm987_vm10, 1.0, %v3258_v12 }
 0x45f   : > { %2286 = vmatprep.mubr.msk.f32.mxu0 %vm1254_vm8, %v2066_v13 }
 0x460   : > { %v948_v14 = vpop.permute.xlu1 %947  ;;  %v942_v15 = vpop.permute.xlu0 %941 }
 0x461   : > { %vm986_vm11 = vcmp.eq.s32.totalorder %v942_v15, %v3825_v9  ;;  %vm988_vm12 = vcmp.eq.s32.totalorder %v948_v14, %v3825_v9 }
 0x462   : > { %v2067_v17 = vsel %vm986_vm11, 1.0, %v3258_v12  ;;  %v2069_v20 = vsel %vm988_vm12, 1.0, %v3258_v12 }
 0x463   : > { %2287 = vmatmul.mubr.msk.f32.vlgmr.msra.gmra.mrb[0].mxu0 %vm1254_vm8, %v2067_v17 }
 0x464   : > { %v954_v18 = vpop.permute.xlu1 %953  ;;  %2289 = vmatprep.mubr.msk.f32.mxu0 %vm1254_vm8, %v2068_v16  ;;  %v951_v19 = vpop.permute.xlu0 %950 }
 0x465   : > { %vm989_vm13 = vcmp.eq.s32.totalorder %v951_v19, %v3825_v9  ;;  %vm990_vm14 = vcmp.eq.s32.totalorder %v954_v18, %v3825_v9 }
 0x466   : > { %v2070_v21 = vsel %vm989_vm13, 1.0, %v3258_v12  ;;  %v2071_v24 = vsel %vm990_vm14, 1.0, %v3258_v12  ;;  %vm3263_vm13 = vmmov (!%p2122_p8), 0  }
 0x467   : > { %2290 = vmatmul.mubr.msk.f32.gmra.mrb[2].mxu0 %vm1254_vm8, %v2069_v20 }
 0x468   : > { %v960_v22 = vpop.permute.xlu1 %959  ;;  %2292 = vmatprep.mubr.msk.f32.mxu0 %vm1254_vm8, %v2070_v21  ;;  %v957_v23 = vpop.permute.xlu0 %956 }
 0x469   : > { %vm991_vm15 = vcmp.eq.s32.totalorder %v957_v23, %v3825_v9  ;;  %vm992_vm0 = vcmp.eq.s32.totalorder %v960_v22, %v3825_v9 }
 0x46a   : > { %v2072_v25 = vsel %vm991_vm15, 1.0, %v3258_v12  ;;  %v2073_v28 = vsel %vm992_vm0, 1.0, %v3258_v12 }
 0x46b   : > { %2293 = vmatmul.mubr.msk.f32.gmra.mrb[4].mxu0 %vm1254_vm8, %v2071_v24 }
 0x46c   : > { %v966_v26 = vpop.permute.xlu1 %965  ;;  %2295 = vmatprep.mubr.msk.f32.mxu0 %vm1254_vm8, %v2072_v25  ;;  %v963_v27 = vpop.permute.xlu0 %962 }
 0x46d   : > { %vm993_vm1 = vcmp.eq.s32.totalorder %v963_v27, %v3825_v9  ;;  %vm994_vm2 = vcmp.eq.s32.totalorder %v966_v26, %v3825_v9 }
 0x46e   : > { %v2074_v29 = vsel %vm993_vm1, 1.0, %v3258_v12  ;;  %v2075_v32 = vsel %vm994_vm2, 1.0, %v3258_v12 }
 0x46f   : > { %2296 = vmatmul.mubr.msk.f32.gmra.mrb[6].mxu0 %vm1254_vm8, %v2073_v28 }
 0x470   : > { %v972_v30 = vpop.permute.xlu1 %971  ;;  %2298 = vmatprep.mubr.msk.f32.mxu0 %vm1254_vm8, %v2074_v29  ;;  %v969_v31 = vpop.permute.xlu0 %968 }
 0x471   : > { %vm995_vm3 = vcmp.eq.s32.totalorder %v969_v31, %v3825_v9  ;;  %vm996_vm4 = vcmp.eq.s32.totalorder %v972_v30, %v3825_v9 }
 0x472   : > { %v2076_v33 = vsel %vm995_vm3, 1.0, %v3258_v12  ;;  %v2077_v36 = vsel %vm996_vm4, 1.0, %v3258_v12 }
 0x473   : > { %2299 = vmatmul.mubr.msk.f32.gmra.mrb[8].mxu0 %vm1254_vm8, %v2075_v32 }
 0x474   : > { %v978_v34 = vpop.permute.xlu1 %977  ;;  %2301 = vmatprep.mubr.msk.f32.mxu0 %vm1254_vm8, %v2076_v33  ;;  %v975_v35 = vpop.permute.xlu0 %974 }
 0x475   : > { %vm997_vm5 = vcmp.eq.s32.totalorder %v975_v35, %v3825_v9  ;;  %vm998_vm6 = vcmp.eq.s32.totalorder %v978_v34, %v3825_v9 }
 0x476   : > { %v2078_v37 = vsel %vm997_vm5, 1.0, %v3258_v12  ;;  %v2079_v40 = vsel %vm998_vm6, 1.0, %v3258_v12 }
 0x477   : > { %2302 = vmatmul.mubr.msk.f32.gmra.mrb[10].mxu0 %vm1254_vm8, %v2077_v36 }
 0x478   : > { %v984_v38 = vpop.permute.xlu1 %983  ;;  %2304 = vmatprep.mubr.msk.f32.mxu0 %vm1254_vm8, %v2078_v37  ;;  %v981_v39 = vpop.permute.xlu0 %980 }
 0x479   : > { %vm999_vm7 = vcmp.eq.s32.totalorder %v981_v39, %v3825_v9  ;;  %vm1000_vm9 = vcmp.eq.s32.totalorder %v984_v38, %v3825_v9 }
 0x47a   : > { %v2080_v41 = vsel %vm999_vm7, 1.0, %v3258_v12  ;;  %v2081_v42 = vsel %vm1000_vm9, 1.0, %v3258_v12 }
 0x47b   : > { %2305 = vmatmul.mubr.msk.f32.gmra.mrb[12].mxu0 %vm1254_vm8, %v2079_v40 }
 0x47c   : > { %2307 = vmatprep.mubr.msk.f32.mxu0 %vm1254_vm8, %v2080_v41 }
 0x47f   : > { %2308 = vmatmul.mubr.msk.f32.gmra.mrb[14].mxu0 %vm1254_vm8, %v2081_v42  ;;  %vm3260_vm8 = vmmov 0  }
 0x480   : > { %2345 = vmatprep.mubr.msk.f32.mxu1 %vm3260_vm8, %v3258_v12  ;;  %2342 = vmatprep.mubr.msk.f32.mxu0 %vm3260_vm8, %v3258_v12 }
 0x4b5   : > { %v2258_v43 = vpop.f32.mrb[0].mxu1 }
 0x4b6   : > { %v1175_v44 = vpop.f32.mrb[1].mxu1  ;;  %v1181_v61 = vadd.f32 %v2258_v43, %v3891_v60 }
 0x4b7   : > { %v1176_v62 = vadd.f32 %v3891_v60, %v1175_v44 }
 0x4b9   : > { %v2261_v45 = vpop.f32.mrb[2].mxu1 }
 0x4ba   : > { %v1185_v46 = vpop.f32.mrb[3].mxu1  ;;  %v1191_v1 = vadd.f32 %v2261_v45, %v3891_v60 }
 0x4bb   : > { %v1186_v4 = vadd.f32 %v3891_v60, %v1185_v46 }
 0x4bd   : > { %v2264_v48 = vpop.f32.mrb[4].mxu1 }
 0x4be   : > { %v1195_v49 = vpop.f32.mrb[5].mxu1  ;;  %v1201_v10 = vadd.f32 %v2264_v48, %v3891_v60 }
 0x4bf   : > { %v1196_v15 = vadd.f32 %v3891_v60, %v1195_v49 }
 0x4c1   : > { %v2267_v50 = vpop.f32.mrb[6].mxu1 }
 0x4c2   : > { %v1205_v51 = vpop.f32.mrb[7].mxu1  ;;  %v1211_v20 = vadd.f32 %v2267_v50, %v3891_v60 }
 0x4c3   : > { %v1206_v24 = vadd.f32 %v3891_v60, %v1205_v51 }
 0x4c5   : > { %v2270_v52 = vpop.f32.mrb[8].mxu1 }
 0x4c6   : > { %v1215_v53 = vpop.f32.mrb[9].mxu1  ;;  %v1221_v29 = vadd.f32 %v2270_v52, %v3891_v60 }
 0x4c7   : > { %v1216_v33 = vadd.f32 %v3891_v60, %v1215_v53 }
 0x4c9   : > { %v2273_v54 = vpop.f32.mrb[10].mxu1 }
 0x4ca   : > { %v3877_v55 = vpop.f32.mrb[11].mxu1  ;;  %v1231_v38 = vadd.f32 %v2273_v54, %v3891_v60 }
 0x4cb   : > { %v1226_v42 = vadd.f32 %v3891_v60, %v3877_v55 }
 0x4cd   : > { %v3879_v56 = vpop.f32.mrb[12].mxu1 }
 0x4ce   : > { %v3881_v57 = vpop.f32.mrb[13].mxu1  ;;  %v1241_v48 = vadd.f32 %v3879_v56, %v3891_v60 }
 0x4cf   : > { %v1236_v52 = vadd.f32 %v3891_v60, %v3881_v57 }
 0x4d1   : > { %v3883_v58 = vpop.f32.mrb[14].mxu1 }
 0x4d2   : > { %v3885_v59 = vpop.f32.mrb[15].mxu1 }
 0x536   : > { %v2288_v63 = vpop.f32.mrb[0].mxu0 }
 0x537   : > { %v1375_v0 = vadd.f32 %v2288_v63, %v1181_v61  ;;  %v1369_v2 = vpop.f32.mrb[1].mxu0 }
 0x538   : > { %v1370_v3 = vadd.f32 %v1369_v2, %v1176_v62  ;;  %v1251_v62 = vadd.f32 %v3883_v58, %v3891_v60 }
 0x539   : > { %v1449_v5 = vmax.f32 %v1375_v0, 0.0 }
 0x53a   : > { %v1448_v6 = vmax.f32 %v1370_v3, 0.0  ;;  %v2291_v7 = vpop.f32.mrb[2].mxu0 }
 0x53b   : > { %v1385_v9 = vadd.f32 %v2291_v7, %v1191_v1  ;;  %v1379_v11 = vpop.f32.mrb[3].mxu0  ;;  %v1246_v1 = vadd.f32 %v3891_v60, %v3885_v59  ;;  %v2115_v60 = vld [vmem:[%s3746_s6] ss:$0 sm:$0xff] }
 0x53c   : > { %v2441_v13 = vpack.c.bf16 %v1449_v5, %v1448_v6  ;;  %v1380_v14 = vadd.f32 %v1379_v11, %v1186_v4  ;;  %v1465_v4 = vshrl.u32 %v935_v8, 7 }
 0x53d   : > { %v1451_v16 = vmax.f32 %v1385_v9, 0.0 }
 0x53e   : > { %v1450_v17 = vmax.f32 %v1380_v14, 0.0  ;;  %v2294_v18 = vpop.f32.mrb[4].mxu0  ;;  %2442 = vmatpush3.bf16.msra.mxu0 %v2441_v13  ;;  %2520 = vmatpush3.bf16.msra.mxu1 %v2441_v13  ;;  %v1466_v59 = vadd.s32 8, %v1465_v4  ;;  %vm1472_vm11 = vcmp.eq.s32.totalorder %v1465_v4, %v2115_v60  ;;  %v1467_v8 = vadd.s32 16, %v1465_v4  ;;  %v1482_v14 = vld [vmem:[#allocation3 + $0x8] sm:$0xff]  ;;  %v1711_v4 = vld [vmem:[#allocation22 + $0x50] sm:$0xff] (!%p2122_p8) }
 0x53f   : > { %v1395_v19 = vadd.f32 %v2294_v18, %v1201_v10  ;;  %v1389_v21 = vpop.f32.mrb[5].mxu0  ;;  %2443 = vmatprep.subr.bf16.mxu0 %v3259_v47  ;;  %2513 = vmatprep.subr.bf16.mxu1 %v3259_v47  ;;  %v3261_v13 = vmov 1.0  }
 0x540   : > { %v2444_v22 = vpack.c.bf16 %v1451_v16, %v1450_v17  ;;  %v1390_v23 = vadd.f32 %v1389_v21, %v1196_v15  ;;  %vm1473_vm10 = vcmp.eq.s32.totalorder %v1466_v59, %v2115_v60  ;;  %vm1474_vm12 = vcmp.eq.s32.totalorder %v1467_v8, %v2115_v60  ;;  %v1481_v15 = vld [vmem:[#allocation3] sm:$0xff]  ;;  %v1483_v21 = vld [vmem:[#allocation3 + $0x10] sm:$0xff]  ;;  %v1714_v8 = vld [vmem:[#allocation22 + $0x68] sm:$0xff] (!%p2122_p8) }
 0x541   : > { %v1453_v25 = vmax.f32 %v1395_v19, 0.0  ;;  %v1577_v60 = vld [vmem:[#allocation2 + $0x8] sm:$0xff] (!%p2122_p8) }
 0x542   : > { %v1452_v26 = vmax.f32 %v1390_v23, 0.0  ;;  %v2297_v27 = vpop.f32.mrb[6].mxu0  ;;  %2445 = vmatpush3.bf16.msra.mxu0 %v2444_v22  ;;  %2521 = vmatpush3.bf16.msra.mxu1 %v2444_v22 }
 0x543   : > { %v1405_v28 = vadd.f32 %v2297_v27, %v1211_v20  ;;  %v1399_v30 = vpop.f32.mrb[7].mxu0  ;;  %2446 = vmatprep.subr.bf16.mxu0 %v3259_v47  ;;  %2514 = vmatprep.subr.bf16.mxu1 %v3259_v47  ;;  %v3262_v27 = vmov (!%p2122_p8), 0.0|0.0  }
 0x544   : > { %v2447_v31 = vpack.c.bf16 %v1453_v25, %v1452_v26  ;;  %v1400_v32 = vadd.f32 %v1399_v30, %v1206_v24  ;;  %v1590_v25 = vld [vmem:[#allocation19 + $0x8] sm:$0xff] (!%p2122_p8)  ;;  %v1591_v26 = vld [vmem:[#allocation19 + $0x10] sm:$0xff] (!%p2122_p8)  ;;  %v3264_v30 = vmov (!%p2122_p8), 0.0  }
 0x545   : > { %v1455_v34 = vmax.f32 %v1405_v28, 0.0 }
 0x546   : > { %v1454_v35 = vmax.f32 %v1400_v32, 0.0  ;;  %v2300_v36 = vpop.f32.mrb[8].mxu0  ;;  %2448 = vmatpush3.bf16.msra.mxu0 %v2447_v31  ;;  %2522 = vmatpush3.bf16.msra.mxu1 %v2447_v31  ;;  %v1593_v32 = vld [vmem:[#allocation19 + $0x20] sm:$0xff] (!%p2122_p8) }
 0x547   : > { %v1415_v37 = vadd.f32 %v2300_v36, %v1221_v29  ;;  %v1409_v39 = vpop.f32.mrb[9].mxu0  ;;  %2449 = vmatprep.subr.bf16.mxu0 %v3259_v47  ;;  %2515 = vmatprep.subr.bf16.mxu1 %v3259_v47  ;;  %v1592_v29 = vld [vmem:[#allocation19 + $0x18] sm:$0xff] (!%p2122_p8)  ;;  %v1701_v36 = vld [vmem:[#allocation22] sm:$0xff] (!%p2122_p8) }
 0x548   : > { %v2450_v40 = vpack.c.bf16 %v1455_v34, %v1454_v35  ;;  %v1410_v41 = vadd.f32 %v1409_v39, %v1216_v33  ;;  %v2468_v31 = vpack.c.bf16 (!%p2122_p8), %v1592_v29, %v1591_v26  ;;  %v1594_v33 = vld [vmem:[#allocation19 + $0x28] sm:$0xff] (!%p2122_p8)  ;;  %v1595_v35 = vld [vmem:[#allocation19 + $0x30] sm:$0xff] (!%p2122_p8) }
 0x549   : > { %v1457_v43 = vmax.f32 %v1415_v37, 0.0  ;;  %v2471_v34 = vpack.c.bf16 (!%p2122_p8), %v1594_v33, %v1593_v32  ;;  %v1702_v37 = vld [vmem:[#allocation22 + $0x8] sm:$0xff] (!%p2122_p8) }
 0x54a   : > { %v1456_v44 = vmax.f32 %v1410_v41, 0.0  ;;  %v2303_v45 = vpop.f32.mrb[10].mxu0  ;;  %2451 = vmatpush3.bf16.msra.mxu0 %v2450_v40  ;;  %2523 = vmatpush3.bf16.msra.mxu1 %v2450_v40  ;;  %v2489_v39 = vpack.c.bf16 (!%p2122_p8), %v1702_v37, %v1701_v36  ;;  %v1703_v40 = vld [vmem:[#allocation22 + $0x10] sm:$0xff] (!%p2122_p8)  ;;  %v1704_v41 = vld [vmem:[#allocation22 + $0x18] sm:$0xff] (!%p2122_p8) }
 0x54b   : > { %v1425_v46 = vadd.f32 %v2303_v45, %v1231_v38  ;;  %v1419_v49 = vpop.f32.mrb[11].mxu0  ;;  %2452 = vmatprep.subr.bf16.mxu0 %v3259_v47  ;;  %2516 = vmatprep.subr.bf16.mxu1 %v3259_v47  ;;  %v1596_v38 = vld [vmem:[#allocation19 + $0x38] sm:$0xff] (!%p2122_p8)  ;;  %v1706_v45 = vld [vmem:[#allocation22 + $0x28] sm:$0xff] (!%p2122_p8) }
 0x54c   : > { %v2453_v50 = vpack.c.bf16 %v1457_v43, %v1456_v44  ;;  %v1420_v51 = vadd.f32 %v1419_v49, %v1226_v42  ;;  %v2492_v42 = vpack.c.bf16 (!%p2122_p8), %v1704_v41, %v1703_v40  ;;  %v2474_v43 = vpack.c.bf16 (!%p2122_p8), %v1596_v38, %v1595_v35  ;;  %v1705_v44 = vld [vmem:[#allocation22 + $0x20] sm:$0xff] (!%p2122_p8) }
 0x54d   : > { %v1459_v53 = vmax.f32 %v1425_v46, 0.0  ;;  %v1597_v46 = vld [vmem:[#allocation19 + $0x40] sm:$0xff] (!%p2122_p8)  ;;  %v2495_v49 = vpack.c.bf16 (!%p2122_p8), %v1706_v45, %v1705_v44 }
 0x54e   : > { %v1458_v54 = vmax.f32 %v1420_v51, 0.0  ;;  %v2306_v55 = vpop.f32.mrb[12].mxu0  ;;  %2454 = vmatpush3.bf16.msra.mxu0 %v2453_v50  ;;  %2524 = vmatpush3.bf16.msra.mxu1 %v2453_v50  ;;  %v1707_v51 = vld [vmem:[#allocation22 + $0x30] sm:$0xff] (!%p2122_p8)  ;;  %v2124_v40 = vld [vmem:[#allocation23] ss:$0 sm:$0xff] (!%p2122_p8) }
 0x54f   : > { %v1435_v61 = vadd.f32 %v2306_v55, %v1241_v48  ;;  %v1429_v56 = vpop.f32.mrb[13].mxu0  ;;  %2455 = vmatprep.subr.bf16.mxu0 %v3259_v47  ;;  %2517 = vmatprep.subr.bf16.mxu1 %v3259_v47  ;;  %v1598_v48 = vld [vmem:[#allocation19 + $0x48] sm:$0xff] (!%p2122_p8) }
 0x550   : > { %v2456_v63 = vpack.c.bf16 %v1459_v53, %v1458_v54  ;;  %v1430_v0 = vadd.f32 %v1429_v56, %v1236_v52  ;;  %v2477_v50 = vpack.c.bf16 (!%p2122_p8), %v1598_v48, %v1597_v46  ;;  %v1708_v52 = vld [vmem:[#allocation22 + $0x38] sm:$0xff] (!%p2122_p8)  ;;  %v1599_v53 = vld [vmem:[#allocation19 + $0x50] sm:$0xff] (!%p2122_p8) }
 0x551   : > { %v1461_v57 = vmax.f32 %v1435_v61, 0.0  ;;  %v1600_v54 = vld [vmem:[#allocation19 + $0x58] sm:$0xff] (!%p2122_p8)  ;;  %v2498_v55 = vpack.c.bf16 (!%p2122_p8), %v1708_v52, %v1707_v51  ;;  %v1710_v56 = vld [vmem:[#allocation22 + $0x48] sm:$0xff] (!%p2122_p8) }
 0x552   : > { %v1460_v2 = vmax.f32 %v1430_v0, 0.0  ;;  %v2309_v3 = vpop.f32.mrb[14].mxu0  ;;  %2457 = vmatpush3.bf16.msra.mxu0 %v2456_v63  ;;  %2525 = vmatpush3.bf16.msra.mxu1 %v2456_v63  ;;  %v2480_v61 = vpack.c.bf16 (!%p2122_p8), %v1600_v54, %v1599_v53  ;;  %v1601_v63 = vld [vmem:[#allocation19 + $0x60] sm:$0xff] (!%p2122_p8)  ;;  %v1602_v0 = vld [vmem:[#allocation19 + $0x68] sm:$0xff] (!%p2122_p8) }
 0x553   : > { %v1445_v5 = vadd.f32 %v2309_v3, %v1251_v62  ;;  %v1439_v58 = vpop.f32.mrb[15].mxu0  ;;  %2458 = vmatprep.subr.bf16.mxu0 %v3259_v47  ;;  %2518 = vmatprep.subr.bf16.mxu1 %v3259_v47  ;;  %v1709_v62 = vld [vmem:[#allocation22 + $0x40] sm:$0xff] (!%p2122_p8)  ;;  %v1579_v3 = vstv (!%p2122_p8), %s1575_s9 }
 0x554   : > { %v2459_v6 = vpack.c.bf16 %v1461_v57, %v1460_v2  ;;  %v1440_v7 = vadd.f32 %v1439_v58, %v1246_v1  ;;  %v2501_v1 = vpack.c.bf16 (!%p2122_p8), %v1710_v56, %v1709_v62  ;;  %v2483_v57 = vpack.c.bf16 (!%p2122_p8), %v1602_v0, %v1601_v63  ;;  %v1576_v2 = vld [vmem:[#allocation2] sm:$0xff] (!%p2122_p8) }
 0x555   : > { %v1463_v9 = vmax.f32 %v1445_v5, 0.0  ;;  %v1712_v5 = vld [vmem:[#allocation22 + $0x58] sm:$0xff] (!%p2122_p8)  ;;  %v1603_v58 = vld [vmem:[#allocation19 + $0x70] sm:$0xff] (!%p2122_p8) }
 0x556   : > { %v1462_v10 = vmax.f32 %v1440_v7, 0.0  ;;  %2460 = vmatpush3.bf16.msra.mxu0 %v2459_v6  ;;  %2526 = vmatpush3.bf16.msra.mxu1 %v2459_v6  ;;  %v1604_v6 = vld [vmem:[#allocation19 + $0x78] sm:$0xff] (!%p2122_p8)  ;;  %v1580_v7 = vmul.f32 (!%p2122_p8), %v1579_v3, %v1576_v2 }
 0x557   : > { %2461 = vmatprep.subr.bf16.mxu0 %v3259_v47  ;;  %2519 = vmatprep.subr.bf16.mxu1 %v3259_v47  ;;  %v2486_v59 = vpack.c.bf16 (!%p2122_p8), %v1604_v6, %v1603_v58 }
 0x558   : > { %v2462_v11 = vpack.c.bf16 %v1463_v9, %v1462_v10  ;;  %v2504_v10 = vpack.c.bf16 (!%p2122_p8), %v1712_v5, %v1711_v4 }
 0x55a   : > { %2463 = vmatpush3.bf16.msra.mxu0 %v2462_v11  ;;  %2527 = vmatpush3.bf16.msra.mxu1 %v2462_v11  ;;  %v1713_v11 = vld [vmem:[#allocation22 + $0x60] sm:$0xff] (!%p2122_p8) }
 0x55b   : > { %2464 = vmatprep.subr.bf16.mxu0 (!%p2122_p8), %v3262_v27  ;;  %2488 = vmatprep.subr.bf16.mxu1 (!%p2122_p8), %v3262_v27 }
 0x55d   : > { %2346 = vmatmul.mubr.msk.f32.vlgmr.msra.gmra.mrb[16].mxu1 %vm1473_vm10, %v3261_v13  ;;  %2343 = vmatmul.mubr.msk.f32.vlgmr.msra.gmra.mrb[16].mxu0 %vm1472_vm11, %v3261_v13 }
 0x55e   : > { %2348 = vmatprep.mubr.msk.f32.mxu1 %vm3260_vm8, %v3258_v12  ;;  %v1589_v12 = vld [vmem:[#allocation19] sm:$0xff] (!%p2122_p8)  ;;  %2383 = vmatprep.mubr.msk.f32.mxu0 (!%p2122_p8), %vm3263_vm13, %v3264_v30 }
 0x55f   : > { %v2465_v28 = vpack.c.bf16 (!%p2122_p8), %v1590_v25, %v1589_v12  ;;  %2490 = vmatpush3.bf16.msra.mxu1 (!%p2122_p8), %v2489_v39 }
 0x560   : > { %2491 = vmatprep.subr.bf16.mxu1 (!%p2122_p8), %v3262_v27 }
 0x561   : > { %2349 = vmatmul.mubr.msk.f32.gmra.mrb[18].mxu1 %vm1474_vm12, %v3261_v13  ;;  %2466 = vmatpush3.bf16.msra.mxu0 (!%p2122_p8), %v2465_v28 }
 0x562   : > { %2424 = vmatprep.mubr.msk.f32.mxu1 (!%p2122_p8), %vm3263_vm13, %v3264_v30  ;;  %2467 = vmatprep.subr.bf16.mxu0 (!%p2122_p8), %v3262_v27 }
 0x563   : > { %2493 = vmatpush3.bf16.msra.mxu1 (!%p2122_p8), %v2492_v42 }
 0x564   : > { %2494 = vmatprep.subr.bf16.mxu1 (!%p2122_p8), %v3262_v27 }
 0x565   : > { %2469 = vmatpush3.bf16.msra.mxu0 (!%p2122_p8), %v2468_v31 }
 0x566   : > { %2470 = vmatprep.subr.bf16.mxu0 (!%p2122_p8), %v3262_v27 }
 0x567   : > { %2496 = vmatpush3.bf16.msra.mxu1 (!%p2122_p8), %v2495_v49 }
 0x568   : > { %2497 = vmatprep.subr.bf16.mxu1 (!%p2122_p8), %v3262_v27 }
 0x569   : > { %2472 = vmatpush3.bf16.msra.mxu0 (!%p2122_p8), %v2471_v34 }
 0x56a   : > { %2473 = vmatprep.subr.bf16.mxu0 (!%p2122_p8), %v3262_v27 }
 0x56b   : > { %2499 = vmatpush3.bf16.msra.mxu1 (!%p2122_p8), %v2498_v55 }
 0x56c   : > { %2500 = vmatprep.subr.bf16.mxu1 (!%p2122_p8), %v3262_v27 }
 0x56d   : > { %2475 = vmatpush3.bf16.msra.mxu0 (!%p2122_p8), %v2474_v43 }
 0x56e   : > { %2476 = vmatprep.subr.bf16.mxu0 (!%p2122_p8), %v3262_v27 }
 0x56f   : > { %2502 = vmatpush3.bf16.msra.mxu1 (!%p2122_p8), %v2501_v1 }
 0x570   : > { %2503 = vmatprep.subr.bf16.mxu1 (!%p2122_p8), %v3262_v27 }
 0x571   : > { %2478 = vmatpush3.bf16.msra.mxu0 (!%p2122_p8), %v2477_v50 }
 0x572   : > { %2479 = vmatprep.subr.bf16.mxu0 (!%p2122_p8), %v3262_v27 }
 0x573   : > { %2505 = vmatpush3.bf16.msra.mxu1 (!%p2122_p8), %v2504_v10 }
 0x574   : > { %2506 = vmatprep.subr.bf16.mxu1 (!%p2122_p8), %v3262_v27 }
 0x575   : > { %2481 = vmatpush3.bf16.msra.mxu0 (!%p2122_p8), %v2480_v61 }
 0x576   : > { %2482 = vmatprep.subr.bf16.mxu0 (!%p2122_p8), %v3262_v27 }
 0x579   : > { %2484 = vmatpush3.bf16.msra.mxu0 (!%p2122_p8), %v2483_v57 }
 0x57a   : > { %2485 = vmatprep.subr.bf16.mxu0 (!%p2122_p8), %v3262_v27 }
 0x57d   : > { %2487 = vmatpush3.bf16.msra.mxu0 (!%p2122_p8), %v2486_v59 }
 0x630   : > { %v1555_v16 = vpop.f32.mrb[16].mxu1  ;;  %v1550_v17 = vpop.f32.mrb[16].mxu0 }
 0x631   : > { %v1565_v47 = vadd.f32 %v1555_v16, %v1482_v14  ;;  %v2347_v18 = vpop.f32.mrb[17].mxu1  ;;  %v1564_v19 = vadd.f32 %v1550_v17, %v1481_v15  ;;  %v2344_v20 = vpop.f32.mrb[17].mxu0  ;;  %1573 = sbr.rel (%p2122_p8) target bundleno = 2039 (0x7f7), region = 136  ;;  %v1581_v14 = vmul.f32 (!%p2122_p8), %v1579_v3, %v1577_v60  ;;  %v2507_v15 = vpack.c.bf16 (!%p2122_p8), %v1714_v8, %v1713_v11  ;;  %v1578_v17 = vld [vmem:[#allocation2 + $0x10] sm:$0xff] (!%p2122_p8) }
 0x632   : > { %v1582_v18 = vmul.f32 (!%p2122_p8), %v1579_v3, %v1578_v17 }
 0x633   : > { %1568 = vst [vmem:[#allocation3 + $0x8] sm:$0xff] %v1565_v47  ;;  %1567 = vst [vmem:[#allocation3] sm:$0xff] %v1564_v19  ;;  %2508 = vmatpush3.bf16.msra.mxu1 (!%p2122_p8), %v2507_v15 }
 0x634   : > { %v1560_v22 = vpop.f32.mrb[18].mxu1  ;;  %2509 = vmatprep.subr.bf16.mxu1 (!%p2122_p8), %v3262_v27 }
 0x635   : > { %v1566_v23 = vadd.f32 %v1560_v22, %v1483_v21  ;;  %v2350_v24 = vpop.f32.mrb[19].mxu1  ;;  %v1715_v21 = vld [vmem:[#allocation22 + $0x70] sm:$0xff] (!%p2122_p8)  ;;  %v1716_v22 = vld [vmem:[#allocation22 + $0x78] sm:$0xff] (!%p2122_p8) }
 0x636   : > { %v2123_v24 = vld [vmem:[#allocation20] ss:$0 sm:$0xff] (!%p2122_p8) }
 0x637   : > { %1569 = vst [vmem:[#allocation3 + $0x10] sm:$0xff] %v1566_v23  ;;  %v2510_v23 = vpack.c.bf16 (!%p2122_p8), %v1716_v22, %v1715_v21 }
 0x639   : > { %2511 = vmatpush3.bf16.msra.mxu1 %v2510_v23 }
 0x63a   : > { %v1583_v9 = vld [vmem:[#allocation3] sm:$0xff]  ;;  %v1584_v16 = vld [vmem:[#allocation3 + $0x8] sm:$0xff] }
 0x63b   : > { %v1586_v13 = vadd.f32 %v1583_v9, %v1580_v7  ;;  %v1587_v47 = vadd.f32 %v1584_v16, %v1581_v14 }
 0x63d   : > { %2384 = vmatmul.mubr.f32.vlgmr.msra.gmra.mrb[0].mxu0 %v1586_v13 }
 0x63e   : > { %2386 = vmatprep.mubr.msk.f32.mxu0 %vm3263_vm13, %v3264_v30  ;;  %v1585_v19 = vld [vmem:[#allocation3 + $0x10] sm:$0xff] }
 0x63f   : > { %v1588_v20 = vadd.f32 %v1585_v19, %v1582_v18 }
 0x641   : > { %2387 = vmatmul.mubr.f32.gmra.mrb[2].mxu0 %v1587_v47 }
 0x642   : > { %2389 = vmatprep.mubr.msk.f32.mxu0 %vm3263_vm13, %v3264_v30 }
 0x645   : > { %2390 = vmatmul.mubr.f32.gmra.mrb[4].mxu0 %v1588_v20 }
 0x710   : > { %v1678_v12 = vpop.f32.mrb[0].mxu0 }
 0x711   : > { %v1679_v25 = vadd.f32 %v2123_v24, %v1678_v12  ;;  %v2385_v26 = vpop.f32.mrb[1].mxu0 }
 0x713   : > { %v1695_v28 = vmul.f32 0.1, %v1679_v25  ;;  %vm1692_vm14 = vcmp.gt.f32.partialorder %v1679_v25, 0.0 }
 0x714   : > { %v1683_v29 = vpop.f32.mrb[2].mxu0 }
 0x715   : > { %v1684_v31 = vadd.f32 %v2123_v24, %v1683_v29  ;;  %v2388_v32 = vpop.f32.mrb[3].mxu0  ;;  %v1698_v27 = vsel %vm1692_vm14, %v1679_v25, %v1695_v28 }
 0x716   : > { %2425 = vmatmul.mubr.f32.vlgmr.msra.gmra.mrb[0].mxu1 %v1698_v27 }
 0x717   : > { %v1696_v33 = vmul.f32 0.1, %v1684_v31  ;;  %2427 = vmatprep.mubr.msk.f32.mxu1 %vm3263_vm13, %v3264_v30  ;;  %vm1693_vm15 = vcmp.gt.f32.partialorder %v1684_v31, 0.0 }
 0x718   : > { %v1688_v34 = vpop.f32.mrb[4].mxu0 }
 0x719   : > { %v1689_v35 = vadd.f32 %v2123_v24, %v1688_v34  ;;  %v2391_v36 = vpop.f32.mrb[5].mxu0  ;;  %v1699_v37 = vsel %vm1693_vm15, %v1684_v31, %v1696_v33 }
 0x71a   : > { %2428 = vmatmul.mubr.f32.gmra.mrb[2].mxu1 %v1699_v37 }
 0x71b   : > { %v1697_v38 = vmul.f32 0.1, %v1689_v35  ;;  %2430 = vmatprep.mubr.msk.f32.mxu1 %vm3263_vm13, %v3264_v30  ;;  %vm1694_vm0 = vcmp.gt.f32.partialorder %v1689_v35, 0.0 }
 0x71d   : > { %v1700_v39 = vsel %vm1694_vm0, %v1689_v35, %v1697_v38 }
 0x71e   : > { %2431 = vmatmul.mubr.f32.gmra.mrb[4].mxu1 %v1700_v39 }
 0x7e9   : > { %v1790_v41 = vpop.f32.mrb[0].mxu1 }
 0x7ea   : > { %v1791_v42 = vadd.f32 %v2124_v40, %v1790_v41  ;;  %v2426_v43 = vpop.f32.mrb[1].mxu1 }
 0x7ec   : > { %v1804_v44 = vmax.f32 %v1791_v42, 0.0 }
 0x7ed   : > { %v1795_v45 = vpop.f32.mrb[2].mxu1 }
 0x7ee   : > { %1807 = vst [vmem:[#allocation25] sm:$0xff] %v1804_v44  ;;  %v1796_v46 = vadd.f32 %v2124_v40, %v1795_v45  ;;  %v2429_v48 = vpop.f32.mrb[3].mxu1 }
 0x7f0   : > { %v1805_v49 = vmax.f32 %v1796_v46, 0.0 }
 0x7f1   : > { %v1800_v50 = vpop.f32.mrb[4].mxu1 }
 0x7f2   : > { %1808 = vst [vmem:[#allocation25 + $0x8] sm:$0xff] %v1805_v49  ;;  %v1801_v51 = vadd.f32 %v2124_v40, %v1800_v50  ;;  %v2432_v52 = vpop.f32.mrb[5].mxu1 }
 0x7f4   : > { %v1806_v53 = vmax.f32 %v1801_v51, 0.0 }
 0x7f6   : > { %1809 = vst [vmem:[#allocation25 + $0x10] sm:$0xff] %v1806_v53 }
 0x7f7 PF: > { %s4140_s27 = sld [smem:[#allocation39_spill]]  ;;  %s3265_s13 = smov [#allocation25]  }
 0x7f8   : > { %s1816_s16 = sshll.u32 %s3265_s13, 4  ;;  %s1817_s16 = int_to_ptr.vmem [resolvable:$true] %s1816_s16 }
 0x7f9   : > { %s3114_s26 = scalar_lea.vmem %s1817_s16, 384  ;;  %p3121_p1 = scmp.lt.s32.totalorder %s1817_s16, %s1817_s16 }
 0x7fa   : > { %p3115_p3 = scmp.ne.s32.totalorder %s1817_s16, %s3114_s26  ;;  %p3122_p7 = scmp.lt.s32.totalorder %s3114_s26, %s3114_s26 }
 0x7fc   : > { %p3123_p6 = por %p3122_p7, %p3121_p1 }
 0x7fd   : > { %p2676_p5 = scmp.eq.s32.totalorder %s4140_s27, 2 }
 0x7ff   : > { %p3116_p4 = pnand %p3115_p3, %p2676_p5 }
 0x801   : > { %p3117_p13 = pneg %p3116_p4 }
 0x803   : > { %p3124_p2 = pnand %p3123_p6, %p3117_p13 }
 0x805   : > { %3127 = shalt.err (!%p3124_p2)
}
 0x806   : > { %s4141_s21 = sld [smem:[#allocation53_spill]] }
 0x80c   : > { %s4142_s0 = smov %s4141_s21  ;;  %s3128_s30 = scalar_lea.hbm %s4141_s21, 384 }
 0x80d   : > { %p3129_p10 = scmp.ne.s32.totalorder %s4142_s0, %s3128_s30  ;;  %p3134_p12 = scmp.lt.u32.totalorder %s3128_s30, %s4142_s0 }
 0x80f   : > { %p3130_p9 = pnand %p3129_p10, %p2676_p5 }
 0x811   : > { %p3131_p11 = pneg %p3130_p9 }
 0x813   : > { %p3136_p0 = pnand %p3134_p12, %p3131_p11 }
 0x815   : > { %3139 = shalt.err (!%p3136_p0)
}
 0x816   : > { %s3266_s5 = smov 128   ;;  %s3267_s29 = smov 8  }
 0x817   : > { %2607 = dma.vmem_to_hbm [thread:$0]  (%p2676_p5), %s1817_s16, 384, %s4142_s0, [#allocation7], %s3266_s5, %s3266_s5, %s3267_s29  }
 0x818   : > { %s3268_s2 = smov [#allocation26]  }
 0x819   : > { %s1830_s6 = sshll.u32 %s3268_s2, 4  ;;  %s1831_s6 = int_to_ptr.vmem [resolvable:$true] %s1830_s6 }
 0x81a   : > { %s3140_s3 = scalar_lea.vmem %s1831_s6, 128  ;;  %p3147_p13 = scmp.lt.s32.totalorder %s1831_s6, %s1831_s6 }
 0x81b   : > { %p3141_p8 = scmp.ne.s32.totalorder %s1831_s6, %s3140_s3  ;;  %p3148_p1 = scmp.lt.s32.totalorder %s3140_s3, %s3140_s3 }
 0x81d   : > { %p3142_p3 = pnand %p3141_p8, %p2676_p5  ;;  %p3149_p7 = por %p3148_p1, %p3147_p13 }
 0x81f   : > { %p3143_p4 = pneg %p3142_p3 }
 0x821   : > { %p3150_p6 = pnand %p3149_p7, %p3143_p4 }
 0x823   : > { %3153 = shalt.err (!%p3150_p6)
}
 0x824   : > { %s4143_s9 = sld [smem:[#allocation54_spill]] }
 0x82a   : > { %s3154_s13 = scalar_lea.hbm %s4143_s9, 128 }
 0x82b   : > { %p3155_p2 = scmp.ne.s32.totalorder %s4143_s9, %s3154_s13  ;;  %p3160_p11 = scmp.lt.u32.totalorder %s3154_s13, %s4143_s9 }
 0x82d   : > { %p3156_p10 = pnand %p3155_p2, %p2676_p5 }
 0x82f   : > { %p3157_p9 = pneg %p3156_p10 }
 0x831   : > { %p3162_p12 = pnand %p3160_p11, %p3157_p9 }
 0x833   : > { %3165 = shalt.err (!%p3162_p12)
}
 0x834   : > { %2609 = dma.vmem_to_hbm [thread:$0]  (%p2676_p5), %s1831_s6, 128, %s4143_s9, [#allocation27]  }
 0x835   : > { %3215 = dma.done.wait (%p2676_p5), [#allocation7], 384  }
 0x836   : > { %3217 = vsyncadd (%p2676_p5), [#allocation7], 4294966912 }
 0x837   : > { %3219 = dma.done.wait (%p2676_p5), [#allocation27], 128  }
 0x838   : > { %3221 = vsyncadd (%p2676_p5), [#allocation27], 4294967168 }
 0x839 PF: > { %s4144_s23 = sld [smem:[#allocation41_spill]]  ;;  %s4145_s20 = sld [smem:[#allocation38_spill]] }
 0x83a   : > { %s4146_s18 = sld [smem:[#allocation42_spill]]  ;;  %s4147_s21 = smov %s3232_s22 }
 0x83f   : > { %p32_p0 = scmp.ge.s32.totalorder %s4144_s23, 5  }
 0x840   : > { %s4148_s22 = smov %s4146_s18 }
 0x841   :  { %34 = sbr.rel (!%p32_p0) target bundleno = 21 (0x15), region = 190 }
 0x848   :  { %1847 = vsyncpa [#allocation6], 1 }
 0x849   :  { %1849 = vsyncpa [#allocation6 + $0x1], 1 }
 0x84a   :  { %1850 = vsyncpa [#allocation9], 1 }
 0x84b   :  { %1851 = vsyncpa [#allocation15], 1 }
 0x84c   :  { %1852 = vsyncpa [#allocation18], 1 }
 0x84d   :  { %1853 = vsyncpa [#allocation21], 1 }
 0x84e   :  { %1854 = vsyncpa [#allocation24], 1 }
 0x84f   :  { %1855 = vsyncpa [#allocation7], 1 }
 0x850   :  { %1857 = vsyncpa [#allocation7 + $0x1], 1 }
 0x851   :  { %1858 = vsyncpa [#allocation27], 1 }

</bundles_post_ra>
